<compile_context>
chip_gen: v7x
topology: tpu7x:2x2x1
jax: 0.10.0
libtpu: 0.0.40
codegen_flags: <defaults>
</compile_context>

<pallas_src>
import functools

import jax
import jax.numpy as jnp
from jax import lax
from jax.experimental import pallas as pl
from jax.experimental.pallas import tpu as pltpu


def _round_up(x, m):
    return ((x + m - 1) // m) * m


def _sepconv_kernel(x_hbm, w_ref, b_ref, o_ref, xbuf, sem, *,
                    K, stride, dilation, TH, TH_in, W_out_p, C_in_p, TC_out,
                    compute_dtype):
    # x_hbm : (N, Hp, Wp, C_in_p)  full input, left in HBM (manual DMA)
    # w_ref : (K*K, C_in_p, TC_out) fused depthwise*BN*pointwise weights (VMEM)
    # b_ref : (1, TC_out)           fused per-output-channel bias (VMEM)
    # o_ref : (1, TH, W_out_p, TC_out) output row band
    # xbuf  : (2, TH_in, Wp, C_in_p)   double-buffered input row band
    # sem   : DMA semaphores, shape (2,)
    n = pl.program_id(0)
    h = pl.program_id(2)
    num_h = pl.num_programs(2)
    slot = h % 2

    def band_copy(h_idx, s):
        row0 = h_idx * (TH * stride)
        return pltpu.make_async_copy(
            x_hbm.at[n, pl.ds(row0, TH_in)], xbuf.at[s], sem.at[s])

    # Prime the pipeline at the start of each (n, co) column of row bands.  This is
    # megacore-safe: every (n, co, h=0) step primes its own chain.
    @pl.when(h == 0)
    def _():
        band_copy(0, 0).start()

    # Wait for the band belonging to this step.
    band_copy(h, slot).wait()

    # Prefetch the next row band while we compute on the current one.
    @pl.when(h + 1 < num_h)
    def _():
        band_copy(h + 1, 1 - slot).start()

    x = xbuf[slot]                                  # (TH_in, Wp, C_in_p)

    hw = TH * W_out_p
    acc = jnp.zeros((hw, TC_out), jnp.float32)
    # Depthwise + BN + pointwise fused: K*K accumulating MXU matmuls.
    for kh in range(K):
        for kw in range(K):
            h0 = kh * dilation
            w0 = kw * dilation
            win = x[h0:h0 + (TH - 1) * stride + 1:stride,
                    w0:w0 + (W_out_p - 1) * stride + 1:stride, :]
            acc = acc + jnp.dot(
                win.reshape(hw, C_in_p).astype(compute_dtype),
                w_ref[kh * K + kw].astype(compute_dtype),
                preferred_element_type=jnp.float32)

    acc = acc + b_ref[0][None, :]
    o_ref[0] = acc.reshape(TH, W_out_p, TC_out).astype(o_ref.dtype)


def separable_conv2d(x_nchw, dw_weight, bn_gamma, bn_beta, bn_mean, bn_var,
                     pw_weight, *, kernel_size=3, stride=1, dilation=1,
                     eps=1e-5, use_bf16_matmul=None):
    """Forward pass of SeparableConv2d (PyTorch semantics, NCHW in / NCHW out)."""
    N, C_in, H, W = x_nchw.shape
    C_out = pw_weight.shape[0]
    K = kernel_size
    k_eff = K + (K - 1) * (dilation - 1)
    pad_total = k_eff - 1
    pad_beg = pad_total // 2

    H_out = (H + pad_total - k_eff) // stride + 1
    W_out = (W + pad_total - k_eff) // stride + 1

    dtype = x_nchw.dtype
    item = jnp.dtype(dtype).itemsize
    if use_bf16_matmul is None:
        use_bf16_matmul = (dtype == jnp.bfloat16)
    compute_dtype = jnp.bfloat16 if use_bf16_matmul else jnp.float32

    # ---- lane-dense channel packing, sublane-aligned output width ----
    C_in_p = _round_up(C_in, 128)
    C_out_p = _round_up(C_out, 128)
    W_out_p = _round_up(W_out, 8)
    Wp_needed = (W_out_p - 1) * stride + k_eff

    # ---- C_out tile: largest 128-multiple divisor whose fused weight block fits ----
    TC_out = 128
    d = C_out_p
    while d >= 128:
        if C_out_p % d == 0 and 2 * K * K * C_in_p * d * 4 <= (12 << 20):
            TC_out = d
            break
        d -= 128
    n_co = C_out_p // TC_out

    # ---- row-band tile TH from a VMEM budget (safe on v7x's 64 MiB VMEM) ----
    def _vmem_estimate(th):
        th_in = (th - 1) * stride + k_eff
        in_band = th_in * Wp_needed * C_in_p * item          # input band
        out_band = th * W_out_p * TC_out * item              # output band
        acc_b = th * W_out_p * TC_out * 4                    # f32 accumulator
        win_b = th * W_out_p * C_in_p * 4                    # window temporaries
        wts = K * K * C_in_p * TC_out * 4                    # fused weights
        return 2 * in_band + 2 * out_band + acc_b + 2 * win_b + 2 * wts + (1 << 20)

    H_cap = _round_up(H_out, 8)
    TH = 8
    for cand in (256, 128, 64, 32, 16, 8):
        cand = min(cand, H_cap)
        if _vmem_estimate(cand) <= (40 << 20):
            TH = cand
            break
    vmem_limit = int(min(48 << 20, max(32 << 20, _vmem_estimate(TH) + (4 << 20))))

    H_out_p = _round_up(H_out, TH)
    n_h = H_out_p // TH
    TH_in = (TH - 1) * stride + k_eff
    Hp_needed = (H_out_p - 1) * stride + k_eff

    # ---- input prep: NCHW -> NHWC, fixed padding + alignment padding + channel pad ----
    # TODO(synk): handle the spatial halo in-kernel (masked edge taps) to avoid this
    # host-side jnp.pad HBM pass.
    x = jnp.transpose(x_nchw, (0, 2, 3, 1))                  # NHWC
    pad_h_end = max(Hp_needed - (H + pad_beg), 0)
    pad_w_end = max(Wp_needed - (W + pad_beg), 0)
    x = jnp.pad(x, ((0, 0), (pad_beg, pad_h_end), (pad_beg, pad_w_end),
                    (0, C_in_p - C_in)))
    Wp_k = x.shape[2]

    # ---- fold BN into the weights; fuse depthwise & pointwise weights per tap ----
    f32 = jnp.float32
    dw = jnp.transpose(dw_weight[:, 0, :, :].astype(f32), (1, 2, 0))   # (K,K,C_in)
    dw = dw.reshape(K * K, C_in)
    scale = bn_gamma.astype(f32) / jnp.sqrt(bn_var.astype(f32) + eps)  # (C_in,)
    bias_bn = bn_beta.astype(f32) - bn_mean.astype(f32) * scale        # (C_in,)
    pw = jnp.transpose(pw_weight[:, :, 0, 0].astype(f32), (1, 0))      # (C_in, C_out)
    w_comb = (dw * scale[None, :])[:, :, None] * pw[None, :, :]        # (K*K,C_in,C_out)
    bias_out = bias_bn @ pw                                            # (C_out,)
    w_comb = jnp.pad(w_comb, ((0, 0), (0, C_in_p - C_in), (0, C_out_p - C_out)))
    bias_out = jnp.pad(bias_out, (0, C_out_p - C_out))[None, :]        # (1, C_out_p)

    # TODO(synk): add a C_in-reduction grid axis for very large C_in where the fused
    # weight block / input band no longer fit the VMEM budget.

    kernel = functools.partial(
        _sepconv_kernel, K=K, stride=stride, dilation=dilation,
        TH=TH, TH_in=TH_in, W_out_p=W_out_p, C_in_p=C_in_p, TC_out=TC_out,
        compute_dtype=compute_dtype)

    out_nhwc = pl.pallas_call(
        kernel,
        out_shape=jax.ShapeDtypeStruct((N, H_out_p, W_out_p, C_out_p), dtype),
        grid_spec=pltpu.PrefetchScalarGridSpec(
            num_scalar_prefetch=0,
            grid=(N, n_co, n_h),
            in_specs=[
                pl.BlockSpec(memory_space=pl.ANY),               # x stays in HBM
                pl.BlockSpec((K * K, C_in_p, TC_out),
                             lambda n, co, h: (0, 0, co)),
                pl.BlockSpec((1, TC_out), lambda n, co, h: (0, co)),
            ],
            out_specs=pl.BlockSpec((1, TH, W_out_p, TC_out),
                                   lambda n, co, h: (n, h, 0, co)),
            scratch_shapes=[
                pltpu.VMEM((2, TH_in, Wp_k, C_in_p), dtype),
                pltpu.SemaphoreType.DMA((2,)),
            ],
        ),
        compiler_params=pltpu.CompilerParams(
            dimension_semantics=("parallel", "parallel", "arbitrary"),
            vmem_limit_bytes=vmem_limit),
    )(x, w_comb, bias_out)

    out = out_nhwc[:, :H_out, :W_out, :C_out]
    return jnp.transpose(out, (0, 3, 1, 2))                   # back to NCHW


def _reference(x_nchw, dw_weight, bn_gamma, bn_beta, bn_mean, bn_var,
               pw_weight, *, kernel_size=3, stride=1, dilation=1, eps=1e-5):
    """Pure-JAX reference (lax convs) for correctness checking."""
    C_in = x_nchw.shape[1]
    k_eff = kernel_size + (kernel_size - 1) * (dilation - 1)
    pad_total = k_eff - 1
    pad_beg = pad_total // 2
    pad_end = pad_total - pad_beg
    x = jnp.pad(x_nchw.astype(jnp.float32),
                ((0, 0), (0, 0), (pad_beg, pad_end), (pad_beg, pad_end)))
    dw = lax.conv_general_dilated(
        x, dw_weight.astype(jnp.float32),
        window_strides=(stride, stride), padding="VALID",
        rhs_dilation=(dilation, dilation), feature_group_count=C_in,
        dimension_numbers=("NCHW", "OIHW", "NCHW"))
    bn = (dw - bn_mean[None, :, None, None]) / jnp.sqrt(
        bn_var[None, :, None, None] + eps)
    bn = bn * bn_gamma[None, :, None, None] + bn_beta[None, :, None, None]
    out = lax.conv_general_dilated(
        bn, pw_weight.astype(jnp.float32), window_strides=(1, 1),
        padding="VALID", dimension_numbers=("NCHW", "OIHW", "NCHW"))
    return out.astype(x_nchw.dtype)


if __name__ == "__main__":
    key = jax.random.PRNGKey(0)
    k1, k2, k3, k4, k5, k6 = jax.random.split(key, 6)

    N, C_in, H, W = 2, 4, 16, 16
    C_out, K = 8, 3

    x = jax.random.normal(k1, (N, C_in, H, W), jnp.float32)
    dw_weight = jax.random.normal(k2, (C_in, 1, K, K), jnp.float32) * 0.2
    pw_weight = jax.random.normal(k3, (C_out, C_in, 1, 1), jnp.float32) * 0.2
    bn_gamma = 1.0 + 0.1 * jax.random.normal(k4, (C_in,), jnp.float32)
    bn_beta = 0.1 * jax.random.normal(k5, (C_in,), jnp.float32)
    bn_mean = 0.05 * jax.random.normal(k6, (C_in,), jnp.float32)
    bn_var = jnp.abs(1.0 + 0.1 * jax.random.normal(k6, (C_in,), jnp.float32))

    out = separable_conv2d(x, dw_weight, bn_gamma, bn_beta, bn_mean, bn_var,
                           pw_weight, kernel_size=K, stride=1, dilation=1)
    out = jax.block_until_ready(out)

    ref = _reference(x, dw_weight, bn_gamma, bn_beta, bn_mean, bn_var,
                     pw_weight, kernel_size=K, stride=1, dilation=1)
    assert out.shape == (N, C_out, H, W), out.shape
    assert jnp.allclose(out, ref, atol=2e-4, rtol=2e-4), float(
        jnp.max(jnp.abs(out - ref)))

    print("KERNEL_OK")
</pallas_src>

<mosaic_0001>
module attributes {stable_mosaic.version = 11 : i64} {
  func.func @_sepconv_kernel(%arg0: i32, %arg1: i32, %arg2: i32, %arg3: memref<2x18x18x128xf32, #tpu.memory_space<any>>, %arg4: memref<9x128x128xf32, #tpu.memory_space<vmem>>, %arg5: memref<1x128xf32, #tpu.memory_space<vmem>>, %arg6: memref<1x16x16x128xf32, #tpu.memory_space<vmem>>, %arg7: memref<2x18x18x128xf32, #tpu.memory_space<vmem>>, %arg8: memref<2x!tpu.dma_semaphore, #tpu.memory_space<semaphore_mem>>) attributes {dimension_semantics = [#tpu.dimension_semantics<parallel>, #tpu.dimension_semantics<parallel>, #tpu.dimension_semantics<arbitrary>], iteration_bounds = array<i64: 2, 1, 1>, scalar_prefetch = 0 : i64, scratch_operands = 2 : i64, tpu.core_type = #tpu.core_type<tc>, window_params = [{}, {transform_indices = @transform_1, window_bounds = array<i64: 9, 128, 128>}, {transform_indices = @transform_2, window_bounds = array<i64: 1, 128>}, {transform_indices = @transform_3, window_bounds = array<i64: 1, 16, 16, 128>}]} {
    %c2_i32 = arith.constant 2 : i32
    %c0_i32 = arith.constant 0 : i32
    %0 = arith.cmpi eq, %c2_i32, %c0_i32 : i32
    %c1_i32 = arith.constant 1 : i32
    %1 = arith.select %0, %c1_i32, %c2_i32 : i32
    %2 = arith.remsi %arg2, %1 : i32
    %c0_i32_0 = arith.constant 0 : i32
    %3 = arith.cmpi ne, %2, %c0_i32_0 : i32
    %c0_i32_1 = arith.constant 0 : i32
    %4 = arith.cmpi slt, %2, %c0_i32_1 : i32
    %c0_i32_2 = arith.constant 0 : i32
    %5 = arith.cmpi slt, %1, %c0_i32_2 : i32
    %6 = arith.xori %4, %5 : i1
    %7 = arith.andi %6, %3 : i1
    %8 = arith.addi %2, %1 : i32
    %9 = arith.select %7, %8, %2 : i32
    %c0_i32_3 = arith.constant 0 : i32
    %10 = arith.cmpi eq, %arg2, %c0_i32_3 : i32
    %11 = arith.extui %10 : i1 to i32
    %c0_i32_4 = arith.constant 0 : i32
    %12 = arith.cmpi ne, %11, %c0_i32_4 : i32
    scf.if %12 {
      %c0_i32_49 = arith.constant 0 : i32
      %c0_i32_50 = arith.constant 0 : i32
      %c0_i32_51 = arith.constant 0 : i32
      %c0_i32_52 = arith.constant 0 : i32
      %c0_i32_53 = arith.constant 0 : i32
      %91 = tpu.memref_slice %arg3[%arg0, %c0_i32_51, %c0_i32_52, %c0_i32_53] : memref<2x18x18x128xf32, #tpu.memory_space<any>> -> memref<1x18x18x128xf32, #tpu.memory_space<any>>
      %92 = tpu.memref_squeeze %91 : memref<1x18x18x128xf32, #tpu.memory_space<any>> -> memref<18x18x128xf32, #tpu.memory_space<any>>
      %c0_i32_54 = arith.constant 0 : i32
      %c0_i32_55 = arith.constant 0 : i32
      %c0_i32_56 = arith.constant 0 : i32
      %93 = tpu.memref_slice %arg7[%c0_i32_49, %c0_i32_54, %c0_i32_55, %c0_i32_56] : memref<2x18x18x128xf32, #tpu.memory_space<vmem>> -> memref<1x18x18x128xf32, #tpu.memory_space<vmem>>
      %94 = tpu.memref_squeeze %93 : memref<1x18x18x128xf32, #tpu.memory_space<vmem>> -> memref<18x18x128xf32, #tpu.memory_space<vmem>>
      %95 = tpu.memref_slice %arg8[%c0_i32_50] : memref<2x!tpu.dma_semaphore, #tpu.memory_space<semaphore_mem>> -> memref<1x!tpu.dma_semaphore, #tpu.memory_space<semaphore_mem>>
      %96 = tpu.memref_squeeze %95 : memref<1x!tpu.dma_semaphore, #tpu.memory_space<semaphore_mem>> -> memref<!tpu.dma_semaphore, #tpu.memory_space<semaphore_mem>>
      tpu.enqueue_dma source(%92 : memref<18x18x128xf32, #tpu.memory_space<any>>) target(%94 : memref<18x18x128xf32, #tpu.memory_space<vmem>>) target_semaphore(%96 : memref<!tpu.dma_semaphore, #tpu.memory_space<semaphore_mem>>)
    } else {
    }
    %c16_i32 = arith.constant 16 : i32
    %13 = arith.muli %arg2, %c16_i32 : i32
    %c0_i32_5 = arith.constant 0 : i32
    %c0_i32_6 = arith.constant 0 : i32
    %14 = tpu.memref_slice %arg3[%arg0, %13, %c0_i32_5, %c0_i32_6] : memref<2x18x18x128xf32, #tpu.memory_space<any>> -> memref<1x18x18x128xf32, #tpu.memory_space<any>>
    %15 = tpu.memref_squeeze %14 : memref<1x18x18x128xf32, #tpu.memory_space<any>> -> memref<18x18x128xf32, #tpu.memory_space<any>>
    %c0_i32_7 = arith.constant 0 : i32
    %c0_i32_8 = arith.constant 0 : i32
    %c0_i32_9 = arith.constant 0 : i32
    %16 = tpu.memref_slice %arg7[%9, %c0_i32_7, %c0_i32_8, %c0_i32_9] : memref<2x18x18x128xf32, #tpu.memory_space<vmem>> -> memref<1x18x18x128xf32, #tpu.memory_space<vmem>>
    %17 = tpu.memref_squeeze %16 : memref<1x18x18x128xf32, #tpu.memory_space<vmem>> -> memref<18x18x128xf32, #tpu.memory_space<vmem>>
    %18 = tpu.memref_slice %arg8[%9] : memref<2x!tpu.dma_semaphore, #tpu.memory_space<semaphore_mem>> -> memref<1x!tpu.dma_semaphore, #tpu.memory_space<semaphore_mem>>
    %19 = tpu.memref_squeeze %18 : memref<1x!tpu.dma_semaphore, #tpu.memory_space<semaphore_mem>> -> memref<!tpu.dma_semaphore, #tpu.memory_space<semaphore_mem>>
    tpu.wait_dma2 semaphore(%19 : memref<!tpu.dma_semaphore, #tpu.memory_space<semaphore_mem>>) src(%15 : memref<18x18x128xf32, #tpu.memory_space<any>>) dst(%17 : memref<18x18x128xf32, #tpu.memory_space<vmem>>)
    %c1_i32_10 = arith.constant 1 : i32
    %20 = arith.addi %arg2, %c1_i32_10 : i32
    %c1_i32_11 = arith.constant 1 : i32
    %21 = arith.cmpi slt, %20, %c1_i32_11 : i32
    %22 = arith.extui %21 : i1 to i32
    %c0_i32_12 = arith.constant 0 : i32
    %23 = arith.cmpi ne, %22, %c0_i32_12 : i32
    scf.if %23 {
      %c1_i32_49 = arith.constant 1 : i32
      %91 = arith.addi %arg2, %c1_i32_49 : i32
      %c1_i32_50 = arith.constant 1 : i32
      %92 = arith.subi %c1_i32_50, %9 : i32
      %c16_i32_51 = arith.constant 16 : i32
      %93 = arith.muli %91, %c16_i32_51 : i32
      %c0_i32_52 = arith.constant 0 : i32
      %c0_i32_53 = arith.constant 0 : i32
      %94 = tpu.memref_slice %arg3[%arg0, %93, %c0_i32_52, %c0_i32_53] : memref<2x18x18x128xf32, #tpu.memory_space<any>> -> memref<1x18x18x128xf32, #tpu.memory_space<any>>
      %95 = tpu.memref_squeeze %94 : memref<1x18x18x128xf32, #tpu.memory_space<any>> -> memref<18x18x128xf32, #tpu.memory_space<any>>
      %c0_i32_54 = arith.constant 0 : i32
      %c0_i32_55 = arith.constant 0 : i32
      %c0_i32_56 = arith.constant 0 : i32
      %96 = tpu.memref_slice %arg7[%92, %c0_i32_54, %c0_i32_55, %c0_i32_56] : memref<2x18x18x128xf32, #tpu.memory_space<vmem>> -> memref<1x18x18x128xf32, #tpu.memory_space<vmem>>
      %97 = tpu.memref_squeeze %96 : memref<1x18x18x128xf32, #tpu.memory_space<vmem>> -> memref<18x18x128xf32, #tpu.memory_space<vmem>>
      %98 = tpu.memref_slice %arg8[%92] : memref<2x!tpu.dma_semaphore, #tpu.memory_space<semaphore_mem>> -> memref<1x!tpu.dma_semaphore, #tpu.memory_space<semaphore_mem>>
      %99 = tpu.memref_squeeze %98 : memref<1x!tpu.dma_semaphore, #tpu.memory_space<semaphore_mem>> -> memref<!tpu.dma_semaphore, #tpu.memory_space<semaphore_mem>>
      tpu.enqueue_dma source(%95 : memref<18x18x128xf32, #tpu.memory_space<any>>) target(%97 : memref<18x18x128xf32, #tpu.memory_space<vmem>>) target_semaphore(%99 : memref<!tpu.dma_semaphore, #tpu.memory_space<semaphore_mem>>)
    } else {
    }
    %24 = arith.index_cast %9 : i32 to index
    %c0 = arith.constant 0 : index
    %c0_13 = arith.constant 0 : index
    %c0_14 = arith.constant 0 : index
    %25 = vector.load %arg7[%24, %c0, %c0_13, %c0_14] : memref<2x18x18x128xf32, #tpu.memory_space<vmem>>, vector<1x18x18x128xf32>
    %26 = vector.shape_cast %25 : vector<1x18x18x128xf32> to vector<18x18x128xf32>
    %cst = arith.constant 0.000000e+00 : f32
    %27 = vector.broadcast %cst : f32 to vector<256x128xf32>
    %28 = vector.extract_strided_slice %26 {offsets = [0, 0, 0], sizes = [16, 16, 128], strides = [1, 1, 1]} : vector<18x18x128xf32> to vector<16x16x128xf32>
    %29 = vector.shape_cast %28 : vector<16x16x128xf32> to vector<256x128xf32>
    %c0_15 = arith.constant 0 : index
    %c0_16 = arith.constant 0 : index
    %c0_17 = arith.constant 0 : index
    %30 = vector.load %arg4[%c0_15, %c0_16, %c0_17] : memref<9x128x128xf32, #tpu.memory_space<vmem>>, vector<1x128x128xf32>
    %31 = vector.shape_cast %30 : vector<1x128x128xf32> to vector<128x128xf32>
    %cst_18 = arith.constant dense<0.000000e+00> : vector<256x128xf32>
    %32 = tpu.matmul %29, %31, %cst_18 {dimension_numbers = #tpu.dot_dimension_numbers<[1], [0], [0], [1], [0, 0, 1, 1], [], []>} : vector<256x128xf32>, vector<128x128xf32>, vector<256x128xf32> -> vector<256x128xf32>
    %33 = arith.addf %27, %32 : vector<256x128xf32>
    %34 = vector.extract_strided_slice %26 {offsets = [0, 1, 0], sizes = [16, 16, 128], strides = [1, 1, 1]} : vector<18x18x128xf32> to vector<16x16x128xf32>
    %35 = vector.shape_cast %34 : vector<16x16x128xf32> to vector<256x128xf32>
    %c1 = arith.constant 1 : index
    %c0_19 = arith.constant 0 : index
    %c0_20 = arith.constant 0 : index
    %36 = vector.load %arg4[%c1, %c0_19, %c0_20] : memref<9x128x128xf32, #tpu.memory_space<vmem>>, vector<1x128x128xf32>
    %37 = vector.shape_cast %36 : vector<1x128x128xf32> to vector<128x128xf32>
    %cst_21 = arith.constant dense<0.000000e+00> : vector<256x128xf32>
    %38 = tpu.matmul %35, %37, %cst_21 {dimension_numbers = #tpu.dot_dimension_numbers<[1], [0], [0], [1], [0, 0, 1, 1], [], []>} : vector<256x128xf32>, vector<128x128xf32>, vector<256x128xf32> -> vector<256x128xf32>
    %39 = arith.addf %33, %38 : vector<256x128xf32>
    %40 = vector.extract_strided_slice %26 {offsets = [0, 2, 0], sizes = [16, 16, 128], strides = [1, 1, 1]} : vector<18x18x128xf32> to vector<16x16x128xf32>
    %41 = vector.shape_cast %40 : vector<16x16x128xf32> to vector<256x128xf32>
    %c2 = arith.constant 2 : index
    %c0_22 = arith.constant 0 : index
    %c0_23 = arith.constant 0 : index
    %42 = vector.load %arg4[%c2, %c0_22, %c0_23] : memref<9x128x128xf32, #tpu.memory_space<vmem>>, vector<1x128x128xf32>
    %43 = vector.shape_cast %42 : vector<1x128x128xf32> to vector<128x128xf32>
    %cst_24 = arith.constant dense<0.000000e+00> : vector<256x128xf32>
    %44 = tpu.matmul %41, %43, %cst_24 {dimension_numbers = #tpu.dot_dimension_numbers<[1], [0], [0], [1], [0, 0, 1, 1], [], []>} : vector<256x128xf32>, vector<128x128xf32>, vector<256x128xf32> -> vector<256x128xf32>
    %45 = arith.addf %39, %44 : vector<256x128xf32>
    %46 = vector.extract_strided_slice %26 {offsets = [1, 0, 0], sizes = [16, 16, 128], strides = [1, 1, 1]} : vector<18x18x128xf32> to vector<16x16x128xf32>
    %47 = vector.shape_cast %46 : vector<16x16x128xf32> to vector<256x128xf32>
    %c3 = arith.constant 3 : index
    %c0_25 = arith.constant 0 : index
    %c0_26 = arith.constant 0 : index
    %48 = vector.load %arg4[%c3, %c0_25, %c0_26] : memref<9x128x128xf32, #tpu.memory_space<vmem>>, vector<1x128x128xf32>
    %49 = vector.shape_cast %48 : vector<1x128x128xf32> to vector<128x128xf32>
    %cst_27 = arith.constant dense<0.000000e+00> : vector<256x128xf32>
    %50 = tpu.matmul %47, %49, %cst_27 {dimension_numbers = #tpu.dot_dimension_numbers<[1], [0], [0], [1], [0, 0, 1, 1], [], []>} : vector<256x128xf32>, vector<128x128xf32>, vector<256x128xf32> -> vector<256x128xf32>
    %51 = arith.addf %45, %50 : vector<256x128xf32>
    %52 = vector.extract_strided_slice %26 {offsets = [1, 1, 0], sizes = [16, 16, 128], strides = [1, 1, 1]} : vector<18x18x128xf32> to vector<16x16x128xf32>
    %53 = vector.shape_cast %52 : vector<16x16x128xf32> to vector<256x128xf32>
    %c4 = arith.constant 4 : index
    %c0_28 = arith.constant 0 : index
    %c0_29 = arith.constant 0 : index
    %54 = vector.load %arg4[%c4, %c0_28, %c0_29] : memref<9x128x128xf32, #tpu.memory_space<vmem>>, vector<1x128x128xf32>
    %55 = vector.shape_cast %54 : vector<1x128x128xf32> to vector<128x128xf32>
    %cst_30 = arith.constant dense<0.000000e+00> : vector<256x128xf32>
    %56 = tpu.matmul %53, %55, %cst_30 {dimension_numbers = #tpu.dot_dimension_numbers<[1], [0], [0], [1], [0, 0, 1, 1], [], []>} : vector<256x128xf32>, vector<128x128xf32>, vector<256x128xf32> -> vector<256x128xf32>
    %57 = arith.addf %51, %56 : vector<256x128xf32>
    %58 = vector.extract_strided_slice %26 {offsets = [1, 2, 0], sizes = [16, 16, 128], strides = [1, 1, 1]} : vector<18x18x128xf32> to vector<16x16x128xf32>
    %59 = vector.shape_cast %58 : vector<16x16x128xf32> to vector<256x128xf32>
    %c5 = arith.constant 5 : index
    %c0_31 = arith.constant 0 : index
    %c0_32 = arith.constant 0 : index
    %60 = vector.load %arg4[%c5, %c0_31, %c0_32] : memref<9x128x128xf32, #tpu.memory_space<vmem>>, vector<1x128x128xf32>
    %61 = vector.shape_cast %60 : vector<1x128x128xf32> to vector<128x128xf32>
    %cst_33 = arith.constant dense<0.000000e+00> : vector<256x128xf32>
    %62 = tpu.matmul %59, %61, %cst_33 {dimension_numbers = #tpu.dot_dimension_numbers<[1], [0], [0], [1], [0, 0, 1, 1], [], []>} : vector<256x128xf32>, vector<128x128xf32>, vector<256x128xf32> -> vector<256x128xf32>
    %63 = arith.addf %57, %62 : vector<256x128xf32>
    %64 = vector.extract_strided_slice %26 {offsets = [2, 0, 0], sizes = [16, 16, 128], strides = [1, 1, 1]} : vector<18x18x128xf32> to vector<16x16x128xf32>
    %65 = vector.shape_cast %64 : vector<16x16x128xf32> to vector<256x128xf32>
    %c6 = arith.constant 6 : index
    %c0_34 = arith.constant 0 : index
    %c0_35 = arith.constant 0 : index
    %66 = vector.load %arg4[%c6, %c0_34, %c0_35] : memref<9x128x128xf32, #tpu.memory_space<vmem>>, vector<1x128x128xf32>
    %67 = vector.shape_cast %66 : vector<1x128x128xf32> to vector<128x128xf32>
    %cst_36 = arith.constant dense<0.000000e+00> : vector<256x128xf32>
    %68 = tpu.matmul %65, %67, %cst_36 {dimension_numbers = #tpu.dot_dimension_numbers<[1], [0], [0], [1], [0, 0, 1, 1], [], []>} : vector<256x128xf32>, vector<128x128xf32>, vector<256x128xf32> -> vector<256x128xf32>
    %69 = arith.addf %63, %68 : vector<256x128xf32>
    %70 = vector.extract_strided_slice %26 {offsets = [2, 1, 0], sizes = [16, 16, 128], strides = [1, 1, 1]} : vector<18x18x128xf32> to vector<16x16x128xf32>
    %71 = vector.shape_cast %70 : vector<16x16x128xf32> to vector<256x128xf32>
    %c7 = arith.constant 7 : index
    %c0_37 = arith.constant 0 : index
    %c0_38 = arith.constant 0 : index
    %72 = vector.load %arg4[%c7, %c0_37, %c0_38] : memref<9x128x128xf32, #tpu.memory_space<vmem>>, vector<1x128x128xf32>
    %73 = vector.shape_cast %72 : vector<1x128x128xf32> to vector<128x128xf32>
    %cst_39 = arith.constant dense<0.000000e+00> : vector<256x128xf32>
    %74 = tpu.matmul %71, %73, %cst_39 {dimension_numbers = #tpu.dot_dimension_numbers<[1], [0], [0], [1], [0, 0, 1, 1], [], []>} : vector<256x128xf32>, vector<128x128xf32>, vector<256x128xf32> -> vector<256x128xf32>
    %75 = arith.addf %69, %74 : vector<256x128xf32>
    %76 = vector.extract_strided_slice %26 {offsets = [2, 2, 0], sizes = [16, 16, 128], strides = [1, 1, 1]} : vector<18x18x128xf32> to vector<16x16x128xf32>
    %77 = vector.shape_cast %76 : vector<16x16x128xf32> to vector<256x128xf32>
    %c8 = arith.constant 8 : index
    %c0_40 = arith.constant 0 : index
    %c0_41 = arith.constant 0 : index
    %78 = vector.load %arg4[%c8, %c0_40, %c0_41] : memref<9x128x128xf32, #tpu.memory_space<vmem>>, vector<1x128x128xf32>
    %79 = vector.shape_cast %78 : vector<1x128x128xf32> to vector<128x128xf32>
    %cst_42 = arith.constant dense<0.000000e+00> : vector<256x128xf32>
    %80 = tpu.matmul %77, %79, %cst_42 {dimension_numbers = #tpu.dot_dimension_numbers<[1], [0], [0], [1], [0, 0, 1, 1], [], []>} : vector<256x128xf32>, vector<128x128xf32>, vector<256x128xf32> -> vector<256x128xf32>
    %81 = arith.addf %75, %80 : vector<256x128xf32>
    %c0_43 = arith.constant 0 : index
    %c0_44 = arith.constant 0 : index
    %82 = vector.load %arg5[%c0_43, %c0_44] : memref<1x128xf32, #tpu.memory_space<vmem>>, vector<1x128xf32>
    %83 = vector.shape_cast %82 : vector<1x128xf32> to vector<128xf32>
    %84 = vector.shape_cast %83 : vector<128xf32> to vector<1x128xf32>
    %85 = vector.broadcast %84 : vector<1x128xf32> to vector<256x128xf32>
    %86 = arith.addf %81, %85 : vector<256x128xf32>
    %87 = vector.shape_cast %86 : vector<256x128xf32> to vector<16x16x128xf32>
    %c0_45 = arith.constant 0 : index
    %c0_46 = arith.constant 0 : index
    %c0_47 = arith.constant 0 : index
    %c0_48 = arith.constant 0 : index
    %88 = vector.load %arg6[%c0_45, %c0_46, %c0_47, %c0_48] : memref<1x16x16x128xf32, #tpu.memory_space<vmem>>, vector<1x16x16x128xf32>
    %89 = vector.shape_cast %88 : vector<1x16x16x128xf32> to vector<16x16x128xf32>
    %90 = vector.shape_cast %87 : vector<16x16x128xf32> to vector<1x16x16x128xf32>
    tpu.vector_store %arg6[%c0_45, %c0_46, %c0_47, %c0_48], %90 {strides = array<i32>} : memref<1x16x16x128xf32, #tpu.memory_space<vmem>>, vector<1x16x16x128xf32>,
    return
  }
  func.func @transform_1(%arg0: i32, %arg1: i32, %arg2: i32) -> (i32, i32, i32) {
    %c0_i32 = arith.constant 0 : i32
    %c0_i32_0 = arith.constant 0 : i32
    %c0_i32_1 = arith.constant 0 : i32
    return %c0_i32, %c0_i32_0, %arg1 : i32, i32, i32
  }
  func.func @transform_2(%arg0: i32, %arg1: i32, %arg2: i32) -> (i32, i32) {
    %c0_i32 = arith.constant 0 : i32
    %c0_i32_0 = arith.constant 0 : i32
    return %c0_i32, %arg1 : i32, i32
  }
  func.func @transform_3(%arg0: i32, %arg1: i32, %arg2: i32) -> (i32, i32, i32, i32) {
    %c0_i32 = arith.constant 0 : i32
    %c0_i32_0 = arith.constant 0 : i32
    return %arg0, %arg2, %c0_i32, %arg1 : i32, i32, i32, i32
  }
}

</mosaic_0001>

<bundles_post_ra>
// kernel: tpu_custom_call.1
= control target key start
LH: loop header
LB: loop body
LE: loop exit
PB: predicated region body
PF: predicated region fallthrough
CT: control target
= control target key end

     0   :  { %8 = vsyncpa [#allocation5], 0  ;;  %s7224_s0 = inlined_call_operand.vmem [shape: f32[2,18,18,128], index: 0, kind: input, shape index: {}]   ;;  %s7225_s1 = inlined_call_operand.vmem [shape: f32[9,128,128], index: 1, kind: input, shape index: {}]   ;;  %s7226_s2 = inlined_call_operand.vmem [shape: f32[1,128], index: 2, kind: input, shape index: {}]   ;;  %s7227_s3 = inlined_call_operand.hbm [shape: f32[2,16,16,128], index: 3, kind: output, shape index: {}]  }
   0x1   :  { %10 = vsyncpa [#allocation5 + $0x1], 0  ;;  %s5809_s12 = smov 0   ;;  %s5811_s13 = smov 0  }
   0x2   :  { %s5813_s14 = smov 0   ;;  %s5815_s15 = smov 0  }
   0x3   :  { %s5817_s16 = smov 0   ;;  %s5819_s17 = smov 0  }
   0x4 LB: > { %s3600_s18 = sadd.s32 4294967295, %s5784_s17   ;;  %s3601_s19 = sadd.s32 4294967294, %s5784_s17   ;;  %s5784_s17 = sphi %s5819_s17, %s16_s17   ;;  %s5780_s16 = sphi %s5817_s16, %s7418_s16   ;;  %s5776_s15 = sphi %s5815_s15, %s7417_s15   ;;  %s5772_s14 = sphi %s5813_s14, %s7416_s14   ;;  %s5768_s13 = sphi %s5811_s13, %s7415_s13   ;;  %s5764_s12 = sphi %s5809_s12, %s7414_s12  }
   0x5   : > { %s35_s20 = sadd.s32 1, %s5780_s16  ;;  %s98_s21 = sadd.s32 1, %s5772_s14 }
   0x6   : > { %p37_p0 = scmp.ge.s32.totalorder %s35_s20, 2  ;;  %p108_p1 = scmp.ne.s32.totalorder %s5772_s14, %s5768_s13 }
   0x7   : > { %p109_p2 = scmp.eq.s32.totalorder %s3600_s18, 1  ;;  %p114_p3 = scmp.ne.s32.totalorder %s5768_s13, %s5764_s12 }
   0x8   : > { %s7420_s20 = smov (%p37_p0, %s35_s20), 0  ;;  %p115_p5 = scmp.eq.s32.totalorder %s3601_s19, 1 }
   0x9   : > { %p5849_p4 = por %p109_p2, %p108_p1  ;;  %s91_s23 = ssub.s32 %s5780_s16, %s7420_s20 }
   0xa   : > { %p3605_p6 = scmp.ge.s32.totalorder %s5784_s17, 1  ;;  %p96_p7 = scmp.eq.s32.totalorder %s91_s23, 0 }
   0xb   : > { %p5856_p8 = por %p115_p5, %p114_p3  ;;  %p146_p9 = scmp.lt.s32.totalorder %s5784_s17, 3 }
   0xc   : > { %s5862_s25 = scalar_select %p96_p7, %s5772_s14, %s98_s21  }
   0xd   : > { %p147_p10 = pnand %p3605_p6, %p146_p9 }
   0xf   : > { %150 = sbr.rel (%p147_p10) target bundleno = 610 (0x262), region = 28 }
  0x16   : > { %s167_s26 = sand.u32 1, %s5768_s13   ;;  %s194_s27 = smul.u32 432, %s5776_s15 }
  0x17   : > { %s5868_s28 = sshll.u32 %s167_s26, 8 }
  0x18   : > { %s5873_s4 = scalar_lea.vmem %s7224_s0, %s194_s27  ;;  %s5930_s5 = scalar_lea.vmem [#allocation4], %s5868_s28 }
  0x19   : > { %v267_v0 = vld [vmem:[%s5873_s4] sm:$0xff]  ;;  %v269_v1 = vld [vmem:[%s5873_s4 + $0x8] sm:$0xff]  ;;  %v271_v2 = vld [vmem:[%s5873_s4 + $0x18] sm:$0xff] }
  0x1a   : > { %268 = vst [vmem:[#allocation2] sm:$0xff] %v267_v0  ;;  %270 = vst [vmem:[#allocation2 + $0x8] sm:$0xff] %v269_v1  ;;  %v273_v3 = vld [vmem:[%s5873_s4 + $0x20] sm:$0xff]  ;;  %v275_v4 = vld [vmem:[%s5873_s4 + $0x30] sm:$0xff] }
  0x1b   : > { %272 = vst [vmem:[#allocation2 + $0x18] sm:$0xff] %v271_v2  ;;  %v277_v5 = vld [vmem:[%s5873_s4 + $0x38] sm:$0xff]  ;;  %274 = vst [vmem:[#allocation2 + $0x20] sm:$0xff] %v273_v3  ;;  %v279_v6 = vld [vmem:[%s5873_s4 + $0x48] sm:$0xff] }
  0x1c   : > { %276 = vst [vmem:[#allocation2 + $0x30] sm:$0xff] %v275_v4  ;;  %278 = vst [vmem:[#allocation2 + $0x38] sm:$0xff] %v277_v5  ;;  %v281_v7 = vld [vmem:[%s5873_s4 + $0x50] sm:$0xff]  ;;  %v283_v8 = vld [vmem:[%s5873_s4 + $0x60] sm:$0xff] }
  0x1d   : > { %280 = vst [vmem:[#allocation2 + $0x48] sm:$0xff] %v279_v6  ;;  %282 = vst [vmem:[#allocation2 + $0x50] sm:$0xff] %v281_v7  ;;  %v285_v9 = vld [vmem:[%s5873_s4 + $0x68] sm:$0xff]  ;;  %v287_v10 = vld [vmem:[%s5873_s4 + $0x78] sm:$0xff] }
  0x1e   : > { %284 = vst [vmem:[#allocation2 + $0x60] sm:$0xff] %v283_v8  ;;  %v289_v11 = vld [vmem:[%s5873_s4 + $0x80] sm:$0xff]  ;;  %286 = vst [vmem:[#allocation2 + $0x68] sm:$0xff] %v285_v9  ;;  %v291_v12 = vld [vmem:[%s5873_s4 + $0x90] sm:$0xff] }
  0x1f   : > { %288 = vst [vmem:[#allocation2 + $0x78] sm:$0xff] %v287_v10  ;;  %290 = vst [vmem:[#allocation2 + $0x80] sm:$0xff] %v289_v11  ;;  %v293_v13 = vld [vmem:[%s5873_s4 + $0x98] sm:$0xff]  ;;  %v295_v14 = vld [vmem:[%s5873_s4 + $0xa8] sm:$0xff] }
  0x20   : > { %292 = vst [vmem:[#allocation2 + $0x90] sm:$0xff] %v291_v12  ;;  %294 = vst [vmem:[#allocation2 + $0x98] sm:$0xff] %v293_v13  ;;  %v297_v15 = vld [vmem:[%s5873_s4 + $0xb0] sm:$0xff]  ;;  %v299_v16 = vld [vmem:[%s5873_s4 + $0xc0] sm:$0xff] }
  0x21   : > { %296 = vst [vmem:[#allocation2 + $0xa8] sm:$0xff] %v295_v14  ;;  %v301_v17 = vld [vmem:[%s5873_s4 + $0xc8] sm:$0xff]  ;;  %298 = vst [vmem:[#allocation2 + $0xb0] sm:$0xff] %v297_v15  ;;  %v303_v18 = vld [vmem:[%s5873_s4 + $0xd8] sm:$0xff] }
  0x22   : > { %300 = vst [vmem:[#allocation2 + $0xc0] sm:$0xff] %v299_v16  ;;  %302 = vst [vmem:[#allocation2 + $0xc8] sm:$0xff] %v301_v17  ;;  %v305_v19 = vld [vmem:[%s5873_s4 + $0xe0] sm:$0xff]  ;;  %v307_v20 = vld [vmem:[%s5873_s4 + $0xf0] sm:$0xff] }
  0x23   : > { %304 = vst [vmem:[#allocation2 + $0xd8] sm:$0xff] %v303_v18  ;;  %306 = vst [vmem:[#allocation2 + $0xe0] sm:$0xff] %v305_v19  ;;  %v309_v21 = vld [vmem:[%s5873_s4 + $0xf8] sm:$0xff]  ;;  %v311_v22 = vld [vmem:[%s5873_s4 + $0x108] sm:$0xff] }
  0x24   : > { %308 = vst [vmem:[#allocation2 + $0xf0] sm:$0xff] %v307_v20  ;;  %v313_v23 = vld [vmem:[%s5873_s4 + $0x110] sm:$0xff]  ;;  %310 = vst [vmem:[#allocation2 + $0xf8] sm:$0xff] %v309_v21  ;;  %v315_v24 = vld [vmem:[%s5873_s4 + $0x120] sm:$0xff] }
  0x25   : > { %312 = vst [vmem:[#allocation2 + $0x108] sm:$0xff] %v311_v22  ;;  %314 = vst [vmem:[#allocation2 + $0x110] sm:$0xff] %v313_v23  ;;  %v317_v25 = vld [vmem:[%s5873_s4 + $0x128] sm:$0xff]  ;;  %v319_v26 = vld [vmem:[%s5873_s4 + $0x138] sm:$0xff] }
  0x26   : > { %316 = vst [vmem:[#allocation2 + $0x120] sm:$0xff] %v315_v24  ;;  %318 = vst [vmem:[#allocation2 + $0x128] sm:$0xff] %v317_v25  ;;  %v321_v27 = vld [vmem:[%s5873_s4 + $0x140] sm:$0xff]  ;;  %v323_v28 = vld [vmem:[%s5873_s4 + $0x150] sm:$0xff] }
  0x27   : > { %320 = vst [vmem:[#allocation2 + $0x138] sm:$0xff] %v319_v26  ;;  %v325_v29 = vld [vmem:[%s5873_s4 + $0x158] sm:$0xff]  ;;  %322 = vst [vmem:[#allocation2 + $0x140] sm:$0xff] %v321_v27  ;;  %v327_v30 = vld [vmem:[%s5873_s4 + $0x168] sm:$0xff] }
  0x28   : > { %324 = vst [vmem:[#allocation2 + $0x150] sm:$0xff] %v323_v28  ;;  %326 = vst [vmem:[#allocation2 + $0x158] sm:$0xff] %v325_v29  ;;  %v329_v31 = vld [vmem:[%s5873_s4 + $0x170] sm:$0xff]  ;;  %v331_v32 = vld [vmem:[%s5873_s4 + $0x180] sm:$0xff] }
  0x29   : > { %328 = vst [vmem:[#allocation2 + $0x168] sm:$0xff] %v327_v30  ;;  %330 = vst [vmem:[#allocation2 + $0x170] sm:$0xff] %v329_v31  ;;  %v333_v33 = vld [vmem:[%s5873_s4 + $0x188] sm:$0xff]  ;;  %v335_v34 = vld [vmem:[%s5873_s4 + $0x198] sm:$0xff] }
  0x2a   : > { %332 = vst [vmem:[#allocation2 + $0x180] sm:$0xff] %v331_v32  ;;  %v337_v35 = vld [vmem:[%s5873_s4 + $0x1a0] sm:$0xff]  ;;  %334 = vst [vmem:[#allocation2 + $0x188] sm:$0xff] %v333_v33  ;;  %v3607_v36 = vld [vmem:[%s5873_s4 + $0x10] sm:$0x3] }
  0x2b   : > { %336 = vst [vmem:[#allocation2 + $0x198] sm:$0xff] %v335_v34  ;;  %338 = vst [vmem:[#allocation2 + $0x1a0] sm:$0xff] %v337_v35  ;;  %v3608_v37 = vld [vmem:[%s5873_s4 + $0x28] sm:$0x3]  ;;  %v3609_v38 = vld [vmem:[%s5873_s4 + $0x40] sm:$0x3] }
  0x2c   : > { %349 = vst [vmem:[#allocation2 + $0x10] sm:$0x3] %v3607_v36  ;;  %351 = vst [vmem:[#allocation2 + $0x28] sm:$0x3] %v3608_v37  ;;  %v3610_v39 = vld [vmem:[%s5873_s4 + $0x58] sm:$0x3] }
  0x2d   : > { %353 = vst [vmem:[#allocation2 + $0x40] sm:$0x3] %v3609_v38  ;;  %v3611_v40 = vld [vmem:[%s5873_s4 + $0x70] sm:$0x3]  ;;  %v3612_v41 = vld [vmem:[%s5873_s4 + $0x88] sm:$0x3] }
  0x2e   : > { %355 = vst [vmem:[#allocation2 + $0x58] sm:$0x3] %v3610_v39  ;;  %357 = vst [vmem:[#allocation2 + $0x70] sm:$0x3] %v3611_v40  ;;  %v3613_v42 = vld [vmem:[%s5873_s4 + $0xa0] sm:$0x3] }
  0x2f   : > { %359 = vst [vmem:[#allocation2 + $0x88] sm:$0x3] %v3612_v41  ;;  %v3614_v43 = vld [vmem:[%s5873_s4 + $0xb8] sm:$0x3]  ;;  %v3615_v44 = vld [vmem:[%s5873_s4 + $0xd0] sm:$0x3] }
  0x30   : > { %361 = vst [vmem:[#allocation2 + $0xa0] sm:$0x3] %v3613_v42  ;;  %363 = vst [vmem:[#allocation2 + $0xb8] sm:$0x3] %v3614_v43  ;;  %v3616_v45 = vld [vmem:[%s5873_s4 + $0xe8] sm:$0x3] }
  0x31   : > { %365 = vst [vmem:[#allocation2 + $0xd0] sm:$0x3] %v3615_v44  ;;  %v3617_v46 = vld [vmem:[%s5873_s4 + $0x100] sm:$0x3]  ;;  %v3618_v47 = vld [vmem:[%s5873_s4 + $0x118] sm:$0x3] }
  0x32   : > { %367 = vst [vmem:[#allocation2 + $0xe8] sm:$0x3] %v3616_v45  ;;  %369 = vst [vmem:[#allocation2 + $0x100] sm:$0x3] %v3617_v46  ;;  %v3619_v48 = vld [vmem:[%s5873_s4 + $0x130] sm:$0x3] }
  0x33   : > { %371 = vst [vmem:[#allocation2 + $0x118] sm:$0x3] %v3618_v47  ;;  %v3620_v49 = vld [vmem:[%s5873_s4 + $0x148] sm:$0x3]  ;;  %v3621_v50 = vld [vmem:[%s5873_s4 + $0x160] sm:$0x3] }
  0x34   : > { %373 = vst [vmem:[#allocation2 + $0x130] sm:$0x3] %v3619_v48  ;;  %375 = vst [vmem:[#allocation2 + $0x148] sm:$0x3] %v3620_v49  ;;  %v3622_v51 = vld [vmem:[%s5873_s4 + $0x178] sm:$0x3] }
  0x35   : > { %377 = vst [vmem:[#allocation2 + $0x160] sm:$0x3] %v3621_v50  ;;  %v3623_v52 = vld [vmem:[%s5873_s4 + $0x190] sm:$0x3]  ;;  %v3624_v53 = vld [vmem:[%s5873_s4 + $0x1a8] sm:$0x3] }
  0x36   : > { %379 = vst [vmem:[#allocation2 + $0x178] sm:$0x3] %v3622_v51  ;;  %381 = vst [vmem:[#allocation2 + $0x190] sm:$0x3] %v3623_v52 }
  0x37   : > { %383 = vst [vmem:[#allocation2 + $0x1a8] sm:$0x3] %v3624_v53 }
  0x38   : > { %387 = vsyncadd [#allocation3], 5184 }
  0x39   : > { %5756 = dma.done.wait [#allocation3], 5184 }
  0x3a   : > { %5757 = vsyncadd [#allocation3], 4294962112  ;;  %v3771_v54 = vld [vmem:[%s7225_s1 + $0x80] sm:$0xff]  ;;  %v3772_v55 = vld [vmem:[%s7225_s1 + $0x88] sm:$0xff]  ;;  %vm719_vm0 = vcmask 1046528   ;;  %vm1299_vm1 = vcmask 1045504  }
  0x3b   : > { %v3819_v56 = vld [vmem:[%s7225_s1 + $0x200] sm:$0xff]  ;;  %v5060_v57 = vpack.c.bf16 %v3772_v55, %v3771_v54  ;;  %v3820_v58 = vld [vmem:[%s7225_s1 + $0x208] sm:$0xff]  ;;  %v3773_v59 = vld [vmem:[%s7225_s1 + $0x90] sm:$0xff]  ;;  %s3907_s11 = sshll.u32 %s5776_s15, 12  ;;  %s3453_s18 = sshll.u32 %s5930_s5, 4  ;;  %s7171_s18 = int_to_ptr.vmem [resolvable:$true] %s3453_s18 }
  0x3c   : > { %v3774_v60 = vld [vmem:[%s7225_s1 + $0x98] sm:$0xff]  ;;  %v5950_v61 = vpack.c.bf16 %v3820_v58, %v3819_v56  ;;  %v3821_v63 = vld [vmem:[%s7225_s1 + $0x210] sm:$0xff]  ;;  %v3775_v1 = vld [vmem:[%s7225_s1 + $0xa0] sm:$0xff]  ;;  %s7169_s23 = scalar_lea.hbm %s7227_s3, %s3907_s11  ;;  %s7178_s15 = scalar_lea.sflag [#allocation5], %s167_s26 }
  0x3d   : > { %v5064_v62 = vpack.c.bf16 %v3774_v60, %v3773_v59  ;;  %v3822_v0 = vld [vmem:[%s7225_s1 + $0x218] sm:$0xff]  ;;  %5061 = vmatprep.subr.bf16.mxu1 %v5060_v57  ;;  %v3776_v3 = vld [vmem:[%s7225_s1 + $0xa8] sm:$0xff]  ;;  %v3823_v4 = vld [vmem:[%s7225_s1 + $0x220] sm:$0xff]  ;;  %s5704_s27 = scalar_lea.vmem %s7171_s18, 4096  ;;  %s5786_s28 = smov [#allocation4]  }
  0x3e   : > { %7313 = vst [vmem:[#allocation10_spill] sm:$0xff] %v5950_v61  ;;  %v5961_v2 = vpack.c.bf16 %v3822_v0, %v3821_v63  ;;  %v3824_v5 = vld [vmem:[%s7225_s1 + $0x228] sm:$0xff]  ;;  %5189 = vmatprep.subr.bf16.mxu0 %v5950_v61  ;;  %5063 = vmatpush3.bf16.msra.mxu1 %v5060_v57  ;;  %v5068_v6 = vpack.c.bf16 %v3776_v3, %v3775_v1  ;;  %v3777_v8 = vld [vmem:[%s7225_s1 + $0xb0] sm:$0xff]  ;;  %v3778_v9 = vld [vmem:[%s7225_s1 + $0xb8] sm:$0xff]  ;;  %p5705_p11 = scmp.ne.s32.totalorder %s7171_s18, %s5704_s27  ;;  %s5708_s29 = sshll.u32 %s5786_s28, 4  ;;  %s5709_s29 = int_to_ptr.vmem [resolvable:$false] %s5708_s29 }
  0x3f   : > { %5191 = vmatpush3.bf16.msra.mxu0 %v5950_v61  ;;  %5065 = vmatprep.subr.bf16.mxu1 %v5064_v62  ;;  %v5975_v7 = vpack.c.bf16 %v3824_v5, %v3823_v4  ;;  %v3825_v10 = vld [vmem:[%s7225_s1 + $0x230] sm:$0xff]  ;;  %v3826_v11 = vld [vmem:[%s7225_s1 + $0x238] sm:$0xff]  ;;  %v5072_v12 = vpack.c.bf16 %v3778_v9, %v3777_v8  ;;  %v3779_v13 = vld [vmem:[%s7225_s1 + $0xc0] sm:$0xff]  ;;  %s5710_s30 = scalar_lea.vmem %s5709_s29, 8192  ;;  %p5711_p0 = scmp.lt.s32.totalorder %s7171_s18, %s5709_s29 }
  0x40   : > { %7314 = vst [vmem:[#allocation11_spill] sm:$0xff] %v5961_v2  ;;  %5193 = vmatprep.subr.bf16.mxu0 %v5961_v2  ;;  %v3780_v14 = vld [vmem:[%s7225_s1 + $0xc8] sm:$0xff]  ;;  %v5997_v15 = vpack.c.bf16 %v3826_v11, %v3825_v10  ;;  %v3827_v16 = vld [vmem:[%s7225_s1 + $0x240] sm:$0xff]  ;;  %v6010_v21 = vld [vmem:[#allocation2 + $0x18] sm:$0xff]  ;;  %p5706_p12 = pnand %p5705_p11, %p5849_p4  ;;  %p5712_p1 = scmp.lt.s32.totalorder %s5710_s30, %s5704_s27 }
  0x41   : > { %7315 = vst [vmem:[#allocation12_spill] sm:$0xff] %v5975_v7  ;;  %v3828_v17 = vld [vmem:[%s7225_s1 + $0x248] sm:$0xff]  ;;  %v6005_v18 = vld [vmem:[#allocation2] sm:$0xff]  ;;  %v725_v24 = vrot.slane %v6010_v21, 1  ;;  %v5076_v26 = vpack.c.bf16 %v3780_v14, %v3779_v13  ;;  %v3781_v28 = vld [vmem:[%s7225_s1 + $0xd0] sm:$0xff] }
  0x42   : > { %5067 = vmatpush3.bf16.msra.mxu1 %v5064_v62  ;;  %7316 = vst [vmem:[#allocation13_spill] sm:$0xff] %v5997_v15  ;;  %v6007_v19 = vld [vmem:[#allocation2 + $0x8] sm:$0xff]  ;;  %v720_v20 = vrot.slane %v6005_v18, 1  ;;  %v6012_v22 = vld [vmem:[#allocation2 + $0x20] sm:$0xff]  ;;  %v6019_v27 = vpack.c.bf16 %v3828_v17, %v3827_v16  ;;  %v3782_v29 = vld [vmem:[%s7225_s1 + $0xd8] sm:$0xff]  ;;  %p5707_p13 = pneg %p5706_p12  ;;  %p5713_p2 = por %p5712_p1, %p5711_p0 }
  0x43   : > { %5195 = vmatpush3.bf16.msra.mxu0 %v5961_v2  ;;  %5069 = vmatprep.subr.bf16.mxu1 %v5068_v6  ;;  %v721_v23 = vrot.slane %v6007_v19, 1  ;;  %v726_v25 = vrot.slane %v6012_v22, 1  ;;  %v3829_v32 = vld [vmem:[%s7225_s1 + $0x250] sm:$0xff]  ;;  %v3830_v33 = vld [vmem:[%s7225_s1 + $0x258] sm:$0xff]  ;;  %v5080_v34 = vpack.c.bf16 %v3782_v29, %v3781_v28  ;;  %v3783_v36 = vld [vmem:[%s7225_s1 + $0xe0] sm:$0xff] }
  0x44   : > { %5197 = vmatprep.subr.bf16.mxu0 %v5975_v7  ;;  %7317 = vst [vmem:[#allocation14_spill] sm:$0xff] %v6019_v27  ;;  %v6044_v35 = vpack.c.bf16 %v3830_v33, %v3829_v32  ;;  %v3784_v37 = vld [vmem:[%s7225_s1 + $0xe8] sm:$0xff]  ;;  %v3831_v38 = vld [vmem:[%s7225_s1 + $0x260] sm:$0xff]  ;;  %v3785_v42 = vld [vmem:[%s7225_s1 + $0xf0] sm:$0xff]  ;;  %p5714_p3 = pnand %p5713_p2, %p5707_p13 }
  0x45   : > { %v722_v30 = vsel %vm719_vm0, %v720_v20, %v721_v23  ;;  %v6033_v31 = vsel %vm719_vm0, %v725_v24, %v726_v25  ;;  %v3832_v39 = vld [vmem:[%s7225_s1 + $0x268] sm:$0xff]  ;;  %v5084_v40 = vpack.c.bf16 %v3784_v37, %v3783_v36  ;;  %v3786_v43 = vld [vmem:[%s7225_s1 + $0xf8] sm:$0xff]  ;;  %v3833_v44 = vld [vmem:[%s7225_s1 + $0x270] sm:$0xff] }
  0x46   : > { %5071 = vmatpush3.bf16.msra.mxu1 %v5068_v6  ;;  %4372 = vmatprep.mubr.f32.mxu1 %v722_v30  ;;  %7318 = vst [vmem:[#allocation15_spill] sm:$0xff] %v6044_v35  ;;  %v6060_v41 = vpack.c.bf16 %v3832_v39, %v3831_v38  ;;  %v3834_v45 = vld [vmem:[%s7225_s1 + $0x278] sm:$0xff]  ;;  %v5088_v46 = vpack.c.bf16 %v3786_v43, %v3785_v42  ;;  %v603_v47 = vld [vmem:[#allocation2 + $0x10] sm:$0x3]  ;;  %v655_v49 = vld [vmem:[%s7225_s1] sm:$0xff] }
  0x47   : > { %5199 = vmatpush3.bf16.msra.mxu0 %v5975_v7  ;;  %5073 = vmatprep.subr.bf16.mxu1 %v5072_v12  ;;  %v6076_v48 = vpack.c.bf16 %v3834_v45, %v3833_v44  ;;  %v656_v50 = vld [vmem:[%s7225_s1 + $0x8] sm:$0xff]  ;;  %v3835_v52 = vld [vmem:[%s7225_s1 + $0x280] sm:$0xff]  ;;  %v723_v54 = vrot.slane %v603_v47, 1  ;;  %v6092_v55 = vld [vmem:[#allocation2 + $0x30] sm:$0xff] }
  0x48   : > { %5201 = vmatprep.subr.bf16.mxu0 %v5997_v15  ;;  %4692 = vmatprep.mubr.f32.mxu0 %v6033_v31  ;;  %7319 = vst [vmem:[#allocation16_spill] sm:$0xff] %v6060_v41  ;;  %v6084_v51 = vld [vmem:[#allocation2 + $0x28] sm:$0x3]  ;;  %v6094_v56 = vld [vmem:[#allocation2 + $0x38] sm:$0xff]  ;;  %v5092_v57 = vpack.c.bf16 %v656_v50, %v655_v49  ;;  %v6099_v60 = vld [vmem:[#allocation2 + $0x40] sm:$0x3] }
  0x49   : > { %7320 = vst [vmem:[#allocation17_spill] sm:$0xff] %v6076_v48  ;;  %v3836_v53 = vld [vmem:[%s7225_s1 + $0x288] sm:$0xff]  ;;  %v728_v58 = vrot.slane %v6084_v51, 1  ;;  %v3837_v62 = vld [vmem:[%s7225_s1 + $0x290] sm:$0xff]  ;;  %v730_v63 = vrot.slane %v6092_v55, 1  ;;  %v731_v0 = vrot.slane %v6094_v56, 1  ;;  %v724_v5 = vsel %vm719_vm0, %v721_v23, %v723_v54 }
  0x4a   : > { %5075 = vmatpush3.bf16.msra.mxu1 %v5072_v12  ;;  %v5220_v59 = vpack.c.bf16 %v3836_v53, %v3835_v52  ;;  %v3838_v1 = vld [vmem:[%s7225_s1 + $0x298] sm:$0xff]  ;;  %v6109_v3 = vld [vmem:[#allocation2 + $0x48] sm:$0xff]  ;;  %v6111_v4 = vld [vmem:[#allocation2 + $0x50] sm:$0xff]  ;;  %v733_v10 = vrot.slane %v6099_v60, 1 }
  0x4b   : > { %5203 = vmatpush3.bf16.msra.mxu0 %v5997_v15  ;;  %5077 = vmatprep.subr.bf16.mxu1 %v5076_v26  ;;  %v657_v6 = vld [vmem:[%s7225_s1 + $0x10] sm:$0xff]  ;;  %v658_v8 = vld [vmem:[%s7225_s1 + $0x18] sm:$0xff]  ;;  %v729_v9 = vsel %vm719_vm0, %v726_v25, %v728_v58  ;;  %v5224_v11 = vpack.c.bf16 %v3838_v1, %v3837_v62  ;;  %v735_v12 = vrot.slane %v6109_v3, 1  ;;  %v736_v13 = vrot.slane %v6111_v4, 1  ;;  %v3839_v16 = vld [vmem:[%s7225_s1 + $0x2a0] sm:$0xff] }
  0x4c   : > { %5205 = vmatprep.subr.bf16.mxu0 %v6019_v27  ;;  %v6129_v14 = vld [vmem:[#allocation2 + $0x58] sm:$0x3]  ;;  %v6135_v17 = vsel %vm719_vm0, %v730_v63, %v731_v0  ;;  %v5096_v20 = vpack.c.bf16 %v658_v8, %v657_v6  ;;  %v3840_v23 = vld [vmem:[%s7225_s1 + $0x2a8] sm:$0xff]  ;;  %v6140_v24 = vld [vmem:[#allocation2 + $0x60] sm:$0xff]  ;;  %v6152_v29 = vsel %vm719_vm0, %v731_v0, %v733_v10  ;;  %v1310_v15 = vrot.slane %v6092_v55, 2 }
  0x4d   : > { %7321 = vst [vmem:[#allocation18_spill] sm:$0xff] %v6135_v17  ;;  %v6142_v25 = vld [vmem:[#allocation2 + $0x68] sm:$0xff]  ;;  %7322 = vst [vmem:[#allocation19_spill] sm:$0xff] %v6152_v29  ;;  %v738_v30 = vrot.slane %v6129_v14, 1  ;;  %v6157_v32 = vsel %vm719_vm0, %v735_v12, %v736_v13  ;;  %v5228_v33 = vpack.c.bf16 %v3840_v23, %v3839_v16  ;;  %v6161_v37 = vld [vmem:[#allocation2 + $0x70] sm:$0x3] }
  0x4e   : > { %5079 = vmatpush3.bf16.msra.mxu1 %v5076_v26  ;;  %v659_v26 = vld [vmem:[%s7225_s1 + $0x20] sm:$0xff]  ;;  %v660_v28 = vld [vmem:[%s7225_s1 + $0x28] sm:$0xff]  ;;  %7323 = vst [vmem:[#allocation20_spill] sm:$0xff] %v6157_v32  ;;  %v741_v36 = vrot.slane %v6142_v25, 1  ;;  %v3842_v38 = vld [vmem:[%s7225_s1 + $0x2b8] sm:$0xff] }
  0x4f   : > { %5207 = vmatpush3.bf16.msra.mxu0 %v6019_v27  ;;  %5081 = vmatprep.subr.bf16.mxu1 %v5080_v34  ;;  %v6169_v39 = vld [vmem:[#allocation2 + $0x78] sm:$0xff]  ;;  %v5100_v42 = vpack.c.bf16 %v660_v28, %v659_v26  ;;  %v661_v43 = vld [vmem:[%s7225_s1 + $0x30] sm:$0xff]  ;;  %v6183_v45 = vsel %vm719_vm0, %v736_v13, %v738_v30  ;;  %v6191_v53 = vld [vmem:[#allocation2 + $0x88] sm:$0x3] }
  0x50   : > { %5209 = vmatprep.subr.bf16.mxu0 %v6044_v35  ;;  %v662_v44 = vld [vmem:[%s7225_s1 + $0x38] sm:$0xff]  ;;  %7324 = vst [vmem:[#allocation21_spill] sm:$0xff] %v6183_v45  ;;  %v745_v50 = vrot.slane %v6169_v39, 1  ;;  %v3843_v54 = vld [vmem:[%s7225_s1 + $0x2c0] sm:$0xff]  ;;  %v6200_v58 = vld [vmem:[#allocation2 + $0x90] sm:$0xff] }
  0x51   : > { %v5104_v62 = vpack.c.bf16 %v662_v44, %v661_v43  ;;  %v663_v63 = vld [vmem:[%s7225_s1 + $0x40] sm:$0xff]  ;;  %v664_v0 = vld [vmem:[%s7225_s1 + $0x48] sm:$0xff]  ;;  %v3845_v12 = vld [vmem:[%s7225_s1 + $0x2d0] sm:$0xff] }
  0x52   : > { %5083 = vmatpush3.bf16.msra.mxu1 %v5080_v34  ;;  %v740_v34 = vrot.slane %v6140_v24, 1  ;;  %v3846_v13 = vld [vmem:[%s7225_s1 + $0x2d8] sm:$0xff]  ;;  %v6231_v16 = vld [vmem:[#allocation2 + $0xa8] sm:$0xff]  ;;  %v5108_v23 = vpack.c.bf16 %v664_v0, %v663_v63  ;;  %v665_v26 = vld [vmem:[%s7225_s1 + $0x50] sm:$0xff] }
  0x53   : > { %5211 = vmatpush3.bf16.msra.mxu0 %v6044_v35  ;;  %5085 = vmatprep.subr.bf16.mxu1 %v5084_v40  ;;  %v666_v28 = vld [vmem:[%s7225_s1 + $0x58] sm:$0xff]  ;;  %v3847_v43 = vld [vmem:[%s7225_s1 + $0x2e0] sm:$0xff]  ;;  %v3848_v44 = vld [vmem:[%s7225_s1 + $0x2e8] sm:$0xff] }
  0x54   : > { %5213 = vmatprep.subr.bf16.mxu0 %v6060_v41  ;;  %v6187_v47 = vsel %vm719_vm0, %v740_v34, %v741_v36  ;;  %v5244_v0 = vpack.c.bf16 %v3848_v44, %v3847_v43  ;;  %v1305_v44 = vrot.slane %v6010_v21, 2  ;;  %v6346_v7 = vld [vmem:[#allocation2 + $0xf8] sm:$0xff] }
  0x55   : > { %7325 = vst [vmem:[#allocation22_spill] sm:$0xff] %v6187_v47 }
  0x56   : > { %5087 = vmatpush3.bf16.msra.mxu1 %v5084_v40  ;;  %v6171_v40 = vld [vmem:[#allocation2 + $0x80] sm:$0xff] }
  0x57   : > { %5215 = vmatpush3.bf16.msra.mxu0 %v6060_v41  ;;  %5089 = vmatprep.subr.bf16.mxu1 %v5088_v46  ;;  %v746_v52 = vrot.slane %v6171_v40, 1  ;;  %v6337_v41 = vld [vmem:[#allocation2 + $0xe8] sm:$0x3] }
  0x58   : > { %5217 = vmatprep.subr.bf16.mxu0 %v6076_v48 }
  0x59   : > { %v6218_v6 = vsel %vm719_vm0, %v745_v50, %v746_v52  ;;  %v5112_v50 = vpack.c.bf16 %v666_v28, %v665_v26  ;;  %v670_v26 = vld [vmem:[%s7225_s1 + $0x78] sm:$0xff] }
  0x5a   : > { %5091 = vmatpush3.bf16.msra.mxu1 %v5088_v46  ;;  %v743_v46 = vrot.slane %v6161_v37, 1  ;;  %7327 = vst [vmem:[#allocation24_spill] sm:$0xff] %v6218_v6 }
  0x5b   : > { %5219 = vmatpush3.bf16.msra.mxu0 %v6076_v48  ;;  %5093 = vmatprep.subr.bf16.mxu1 %v5092_v57  ;;  %v6313_v48 = vld [vmem:[#allocation2 + $0xe0] sm:$0xff] }
  0x5c   : > { %5221 = vmatprep.subr.bf16.mxu0 %v5220_v59  ;;  %v6214_v1 = vsel %vm719_vm0, %v741_v36, %v743_v46  ;;  %v5240_v36 = vpack.c.bf16 %v3846_v13, %v3845_v12  ;;  %v6262_v46 = vld [vmem:[#allocation2 + $0xc0] sm:$0xff]  ;;  %v6284_v12 = vld [vmem:[#allocation2 + $0xd0] sm:$0x3] }
  0x5d   : > { %4373 = vmatmul.mubr.f32.vlgmr.msra.gmra.mrb[0].mxu1 %v724_v5  ;;  %7326 = vst [vmem:[#allocation23_spill] sm:$0xff] %v6214_v1  ;;  %v748_v5 = vrot.slane %v6191_v53, 1 }
  0x5e   : > { %4693 = vmatmul.mubr.f32.vlgmr.msra.gmra.mrb[0].mxu0 %v729_v9  ;;  %5095 = vmatpush3.bf16.msra.mxu1 %v5092_v57  ;;  %v3844_v57 = vld [vmem:[%s7225_s1 + $0x2c8] sm:$0xff] }
  0x5f   : > { %5223 = vmatpush3.bf16.msra.mxu0 %v5220_v59  ;;  %4375 = vmatprep.mubr.f32.mxu1 %v6033_v31  ;;  %v3841_v31 = vld [vmem:[%s7225_s1 + $0x2b0] sm:$0xff]  ;;  %v6202_v59 = vld [vmem:[#allocation2 + $0x98] sm:$0xff]  ;;  %v5236_v8 = vpack.c.bf16 %v3844_v57, %v3843_v54  ;;  %v6245_v30 = vsel %vm719_vm0, %v746_v52, %v748_v5  ;;  %v667_v52 = vld [vmem:[%s7225_s1 + $0x60] sm:$0xff]  ;;  %v760_v5 = vrot.slane %v6262_v46, 1 }
  0x60   : > { %4695 = vmatprep.mubr.f32.mxu0 %v6135_v17  ;;  %5225 = vmatprep.subr.bf16.mxu0 %v5224_v11  ;;  %v5232_v49 = vpack.c.bf16 %v3842_v38, %v3841_v31  ;;  %v751_v10 = vrot.slane %v6202_v59, 1  ;;  %7328 = vst [vmem:[#allocation25_spill] sm:$0xff] %v6245_v30  ;;  %v755_v31 = vrot.slane %v6231_v16, 1  ;;  %v668_v54 = vld [vmem:[%s7225_s1 + $0x68] sm:$0xff] }
  0x61   : > { %4376 = vmatmul.mubr.f32.gmra.mrb[2].mxu1 %v729_v9  ;;  %5097 = vmatprep.subr.bf16.mxu1 %v5096_v20  ;;  %v750_v9 = vrot.slane %v6200_v58, 1  ;;  %v5116_v13 = vpack.c.bf16 %v668_v54, %v667_v52  ;;  %v1306_v52 = vrot.slane %v6012_v22, 2  ;;  %v6311_v54 = vld [vmem:[#allocation2 + $0xd8] sm:$0xff] }
  0x62   : > { %4696 = vmatmul.mubr.f32.gmra.mrb[2].mxu0 %v6152_v29  ;;  %4378 = vmatprep.mubr.f32.mxu1 %v6135_v17  ;;  %v6473_v17 = vld [vmem:[#allocation2 + $0x148] sm:$0x3] }
  0x63   : > { %5227 = vmatpush3.bf16.msra.mxu0 %v5224_v11  ;;  %4698 = vmatprep.mubr.f32.mxu0 %v6157_v32  ;;  %v6222_v11 = vld [vmem:[#allocation2 + $0xa0] sm:$0x3]  ;;  %v6249_v34 = vsel %vm719_vm0, %v750_v9, %v751_v10  ;;  %v6340_v35 = vsel %vm1299_vm1, %v1305_v44, %v1306_v52 }
  0x64   : > { %5229 = vmatprep.subr.bf16.mxu0 %v5228_v33  ;;  %5099 = vmatpush3.bf16.msra.mxu1 %v5096_v20  ;;  %v6233_v20 = vld [vmem:[#allocation2 + $0xb0] sm:$0xff]  ;;  %7329 = vst [vmem:[#allocation26_spill] sm:$0xff] %v6249_v34 }
  0x65   : > { %4379 = vmatmul.mubr.f32.gmra.mrb[4].mxu1 %v6152_v29  ;;  %5101 = vmatprep.subr.bf16.mxu1 %v5100_v42  ;;  %v756_v38 = vrot.slane %v6233_v20, 1 }
  0x66   : > { %4699 = vmatmul.mubr.f32.gmra.mrb[4].mxu0 %v6183_v45  ;;  %4381 = vmatprep.mubr.f32.mxu1 %v6157_v32 }
  0x67   : > { %5231 = vmatpush3.bf16.msra.mxu0 %v5228_v33  ;;  %4701 = vmatprep.mubr.f32.mxu0 %v6187_v47  ;;  %v753_v33 = vrot.slane %v6222_v11, 1  ;;  %v6280_v63 = vsel %vm719_vm0, %v755_v31, %v756_v38 }
  0x68   : > { %5233 = vmatprep.subr.bf16.mxu0 %v5232_v49  ;;  %5103 = vmatpush3.bf16.msra.mxu1 %v5100_v42  ;;  %v6253_v42 = vld [vmem:[#allocation2 + $0xb8] sm:$0x3]  ;;  %7331 = vst [vmem:[#allocation28_spill] sm:$0xff] %v6280_v63 }
  0x69   : > { %4382 = vmatmul.mubr.f32.gmra.mrb[6].mxu1 %v6183_v45  ;;  %5105 = vmatprep.subr.bf16.mxu1 %v5104_v62  ;;  %v6276_v57 = vsel %vm719_vm0, %v751_v10, %v753_v33  ;;  %v3850_v10 = vld [vmem:[%s7225_s1 + $0x2f8] sm:$0xff]  ;;  %v763_v33 = vrot.slane %v6284_v12, 1  ;;  %v6439_v45 = vld [vmem:[#allocation2 + $0x130] sm:$0x3] }
  0x6a   : > { %4702 = vmatmul.mubr.f32.gmra.mrb[6].mxu0 %v6214_v1  ;;  %4384 = vmatprep.mubr.f32.mxu1 %v6187_v47  ;;  %7330 = vst [vmem:[#allocation27_spill] sm:$0xff] %v6276_v57 }
  0x6b   : > { %5235 = vmatpush3.bf16.msra.mxu0 %v5232_v49  ;;  %4704 = vmatprep.mubr.f32.mxu0 %v6218_v6  ;;  %v6264_v49 = vld [vmem:[#allocation2 + $0xc8] sm:$0xff] }
  0x6c   : > { %5237 = vmatprep.subr.bf16.mxu0 %v5236_v8  ;;  %5107 = vmatpush3.bf16.msra.mxu1 %v5104_v62  ;;  %v758_v62 = vrot.slane %v6253_v42, 1  ;;  %v761_v9 = vrot.slane %v6264_v49, 1 }
  0x6d   : > { %4385 = vmatmul.mubr.f32.gmra.mrb[8].mxu1 %v6214_v1  ;;  %5109 = vmatprep.subr.bf16.mxu1 %v5108_v23 }
  0x6e   : > { %4705 = vmatmul.mubr.f32.gmra.mrb[8].mxu0 %v6245_v30  ;;  %4387 = vmatprep.mubr.f32.mxu1 %v6218_v6  ;;  %v6303_v28 = vsel %vm719_vm0, %v756_v38, %v758_v62  ;;  %v6307_v31 = vsel %vm719_vm0, %v760_v5, %v761_v9  ;;  %v3852_v38 = vld [vmem:[%s7225_s1 + $0x308] sm:$0xff] }
  0x6f   : > { %5239 = vmatpush3.bf16.msra.mxu0 %v5236_v8  ;;  %4707 = vmatprep.mubr.f32.mxu0 %v6249_v34  ;;  %v3849_v8 = vld [vmem:[%s7225_s1 + $0x2f0] sm:$0xff]  ;;  %7332 = vst [vmem:[#allocation29_spill] sm:$0xff] %v6303_v28  ;;  %7333 = vst [vmem:[#allocation30_spill] sm:$0xff] %v6307_v31  ;;  %v3788_v5 = vld [vmem:[%s7225_s1 + $0x108] sm:$0xff] }
  0x70   : > { %5241 = vmatprep.subr.bf16.mxu0 %v5240_v36  ;;  %5111 = vmatpush3.bf16.msra.mxu1 %v5108_v23  ;;  %v669_v23 = vld [vmem:[%s7225_s1 + $0x70] sm:$0xff]  ;;  %v5248_v43 = vpack.c.bf16 %v3850_v10, %v3849_v8  ;;  %v1308_v8 = vrot.slane %v6084_v51, 2  ;;  %v6333_v10 = vsel %vm719_vm0, %v761_v9, %v763_v33  ;;  %v1311_v51 = vrot.slane %v6094_v56, 2  ;;  %v3854_v33 = vld [vmem:[%s7225_s1 + $0x318] sm:$0xff] }
  0x71   : > { %4388 = vmatmul.mubr.f32.gmra.mrb[10].mxu1 %v6245_v30  ;;  %5113 = vmatprep.subr.bf16.mxu1 %v5112_v50  ;;  %v5120_v62 = vpack.c.bf16 %v670_v26, %v669_v23  ;;  %7334 = vst [vmem:[#allocation31_spill] sm:$0xff] %v6333_v10  ;;  %v765_v23 = vrot.slane %v6311_v54, 1  ;;  %v766_v26 = vrot.slane %v6313_v48, 1  ;;  %v3853_v9 = vld [vmem:[%s7225_s1 + $0x310] sm:$0xff]  ;;  %v6405_v30 = vld [vmem:[#allocation2 + $0x118] sm:$0x3] }
  0x72   : > { %4708 = vmatmul.mubr.f32.gmra.mrb[10].mxu0 %v6276_v57  ;;  %4390 = vmatprep.mubr.f32.mxu1 %v6249_v34  ;;  %v778_v1 = vrot.slane %v6405_v30, 1 }
  0x73   : > { %5243 = vmatpush3.bf16.msra.mxu0 %v5240_v36  ;;  %4710 = vmatprep.mubr.f32.mxu0 %v6280_v63  ;;  %v3851_v36 = vld [vmem:[%s7225_s1 + $0x300] sm:$0xff]  ;;  %v6366_v2 = vsel %vm719_vm0, %v765_v23, %v766_v26 }
  0x74   : > { %5245 = vmatprep.subr.bf16.mxu0 %v5244_v0  ;;  %5115 = vmatpush3.bf16.msra.mxu1 %v5112_v50  ;;  %v3787_v50 = vld [vmem:[%s7225_s1 + $0x100] sm:$0xff]  ;;  %v5252_v27 = vpack.c.bf16 %v3852_v38, %v3851_v36  ;;  %v768_v36 = vrot.slane %v6337_v41, 1  ;;  %v6363_v38 = vsel %vm1299_vm1, %v1306_v52, %v1308_v8  ;;  %7335 = vst [vmem:[#allocation32_spill] sm:$0xff] %v6366_v2  ;;  %v6377_v52 = vld [vmem:[#allocation2 + $0x108] sm:$0xff]  ;;  %v6379_v8 = vld [vmem:[#allocation2 + $0x110] sm:$0xff] }
  0x75   : > { %4391 = vmatmul.mubr.f32.gmra.mrb[12].mxu1 %v6276_v57  ;;  %5117 = vmatprep.subr.bf16.mxu1 %v5116_v13  ;;  %v6355_v44 = vpack.c.bf16 %v3788_v5, %v3787_v50  ;;  %v771_v5 = vrot.slane %v6346_v7, 1  ;;  %v3855_v23 = vld [vmem:[%s7225_s1 + $0x320] sm:$0xff]  ;;  %v1318_v57 = vrot.slane %v6129_v14, 2  ;;  %v775_v34 = vrot.slane %v6377_v52, 1  ;;  %v3857_v14 = vld [vmem:[%s7225_s1 + $0x330] sm:$0xff] }
  0x76   : > { %4711 = vmatmul.mubr.f32.gmra.mrb[12].mxu0 %v6303_v28  ;;  %4393 = vmatprep.mubr.f32.mxu1 %v6280_v63  ;;  %v5256_v63 = vpack.c.bf16 %v3854_v33, %v3853_v9  ;;  %v6392_v9 = vsel %vm719_vm0, %v766_v26, %v768_v36  ;;  %v6412_v36 = vld [vmem:[#allocation2 + $0x120] sm:$0xff] }
  0x77   : > { %5247 = vmatpush3.bf16.msra.mxu0 %v5244_v0  ;;  %4713 = vmatprep.mubr.f32.mxu0 %v6307_v31  ;;  %v6344_v0 = vld [vmem:[#allocation2 + $0xf0] sm:$0xff]  ;;  %7337 = vst [vmem:[#allocation34_spill] sm:$0xff] %v6392_v9  ;;  %v780_v47 = vrot.slane %v6412_v36, 1 }
  0x78   : > { %5249 = vmatprep.subr.bf16.mxu0 %v5248_v43  ;;  %5119 = vmatpush3.bf16.msra.mxu1 %v5116_v13  ;;  %v1313_v13 = vrot.slane %v6099_v60, 2  ;;  %v770_v50 = vrot.slane %v6344_v0, 1  ;;  %v1315_v60 = vrot.slane %v6109_v3, 2 }
  0x79   : > { %4394 = vmatmul.mubr.f32.gmra.mrb[14].mxu1 %v6303_v28  ;;  %5121 = vmatprep.subr.bf16.mxu1 %v5120_v62  ;;  %v6370_v28 = vld [vmem:[#allocation2 + $0x100] sm:$0x3] }
  0x7a   : > { %4714 = vmatmul.mubr.f32.gmra.mrb[14].mxu0 %v6333_v10  ;;  %4396 = vmatprep.mubr.f32.mxu1 %v6307_v31  ;;  %v6373_v31 = vsel %vm1299_vm1, %v1310_v15, %v1311_v51  ;;  %v3856_v15 = vld [vmem:[%s7225_s1 + $0x328] sm:$0xff]  ;;  %v773_v33 = vrot.slane %v6370_v28, 1 }
  0x7b   : > { %5251 = vmatpush3.bf16.msra.mxu0 %v5248_v43  ;;  %4772 = vmatprep.mubr.f32.mxu0 %v6340_v35  ;;  %7336 = vst [vmem:[#allocation33_spill] sm:$0xff] %v6373_v31  ;;  %v1316_v43 = vrot.slane %v6111_v4, 2 }
  0x7c   : > { %5253 = vmatprep.subr.bf16.mxu0 %v5252_v27  ;;  %5123 = vmatpush3.bf16.msra.mxu1 %v5120_v62  ;;  %v6395_v62 = vsel %vm1299_vm1, %v1311_v51, %v1313_v13  ;;  %v1320_v51 = vrot.slane %v6140_v24, 2  ;;  %v6414_v13 = vld [vmem:[#allocation2 + $0x128] sm:$0xff]  ;;  %v6426_v6 = vsel %vm719_vm0, %v771_v5, %v773_v33  ;;  %v1326_v33 = vrot.slane %v6171_v40, 2 }
  0x7d   : > { %4397 = vmatmul.mubr.f32.gmra.mrb[16].mxu1 %v6333_v10  ;;  %5125 = vmatprep.subr.bf16.mxu1 %v6355_v44  ;;  %7338 = vst [vmem:[#allocation35_spill] sm:$0xff] %v6395_v62  ;;  %v6400_v10 = vsel %vm719_vm0, %v770_v50, %v771_v5  ;;  %v6408_v26 = vsel %vm1299_vm1, %v1315_v60, %v1316_v43  ;;  %v3858_v60 = vld [vmem:[%s7225_s1 + $0x338] sm:$0xff]  ;;  %7341 = vst [vmem:[#allocation38_spill] sm:$0xff] %v6426_v6 }
  0x7e   : > { %4773 = vmatmul.mubr.f32.vlgmr.msra.gmra.mrb[0].mxu0 %v6363_v38  ;;  %4399 = vmatprep.mubr.f32.mxu1 %v6366_v2  ;;  %7339 = vst [vmem:[#allocation36_spill] sm:$0xff] %v6400_v10  ;;  %v776_v2 = vrot.slane %v6379_v8, 1  ;;  %7340 = vst [vmem:[#allocation37_spill] sm:$0xff] %v6408_v26  ;;  %v5260_v50 = vpack.c.bf16 %v3856_v15, %v3855_v23  ;;  %v1323_v23 = vrot.slane %v6161_v37, 2  ;;  %v1325_v37 = vrot.slane %v6169_v39, 2 }
  0x7f   : > { %5255 = vmatpush3.bf16.msra.mxu0 %v5252_v27  ;;  %4775 = vmatprep.mubr.f32.mxu0 %v6373_v31  ;;  %v1321_v27 = vrot.slane %v6142_v25, 2  ;;  %v6432_v15 = vsel %vm1299_vm1, %v1316_v43, %v1318_v57  ;;  %v6446_v57 = vld [vmem:[#allocation2 + $0x138] sm:$0xff]  ;;  %v3859_v43 = vld [vmem:[%s7225_s1 + $0x340] sm:$0xff] }
  0x80   : > { %5257 = vmatprep.subr.bf16.mxu0 %v5256_v63  ;;  %7342 = vst [vmem:[#allocation39_spill] sm:$0xff] %v6432_v15  ;;  %v6460_v32 = vsel %vm719_vm0, %v776_v2, %v778_v1  ;;  %v785_v61 = vrot.slane %v6446_v57, 1  ;;  %v1330_v1 = vrot.slane %v6200_v58, 2 }
  0x81   : > { %4400 = vmatmul.mubr.f32.gmra.mrb[18].mxu1 %v6392_v9  ;;  %v6435_v9 = vsel %vm719_vm0, %v775_v34, %v776_v2  ;;  %v6442_v5 = vsel %vm1299_vm1, %v1320_v51, %v1321_v27  ;;  %v5264_v34 = vpack.c.bf16 %v3858_v60, %v3857_v14  ;;  %v3860_v51 = vld [vmem:[%s7225_s1 + $0x348] sm:$0xff]  ;;  %7345 = vst [vmem:[#allocation42_spill] sm:$0xff] %v6460_v32  ;;  %v783_v14 = vrot.slane %v6439_v45, 1 }
  0x82   : > { %4776 = vmatmul.mubr.f32.gmra.mrb[2].mxu0 %v6395_v62  ;;  %4402 = vmatprep.mubr.f32.mxu1 %v6400_v10  ;;  %7343 = vst [vmem:[#allocation40_spill] sm:$0xff] %v6435_v9  ;;  %v781_v10 = vrot.slane %v6414_v13, 1  ;;  %7344 = vst [vmem:[#allocation41_spill] sm:$0xff] %v6442_v5  ;;  %v6463_v29 = vsel %vm1299_vm1, %v1321_v27, %v1323_v23  ;;  %v6476_v2 = vsel %vm1299_vm1, %v1325_v37, %v1326_v33  ;;  %v6480_v23 = vld [vmem:[#allocation2 + $0x150] sm:$0xff]  ;;  %v3862_v37 = vld [vmem:[%s7225_s1 + $0x358] sm:$0xff] }
  0x83   : > { %4778 = vmatprep.mubr.f32.mxu0 %v6408_v26  ;;  %5259 = vmatpush3.bf16.msra.mxu0 %v5256_v63  ;;  %v6448_v63 = vld [vmem:[#allocation2 + $0x140] sm:$0xff]  ;;  %7346 = vst [vmem:[#allocation43_spill] sm:$0xff] %v6463_v29  ;;  %7348 = vst [vmem:[#allocation45_spill] sm:$0xff] %v6476_v2  ;;  %v1331_v27 = vrot.slane %v6202_v59, 2  ;;  %v790_v26 = vrot.slane %v6480_v23, 1 }
  0x84   : > { %5261 = vmatprep.subr.bf16.mxu0 %v5260_v50  ;;  %v6468_v60 = vsel %vm719_vm0, %v780_v47, %v781_v10  ;;  %v6482_v47 = vld [vmem:[#allocation2 + $0x158] sm:$0xff] }
  0x85   : > { %4403 = vmatmul.mubr.f32.gmra.mrb[20].mxu1 %v6426_v6  ;;  %7347 = vst [vmem:[#allocation44_spill] sm:$0xff] %v6468_v60  ;;  %v1328_v6 = vrot.slane %v6191_v53, 2  ;;  %v5268_v53 = vpack.c.bf16 %v3860_v51, %v3859_v43  ;;  %v1333_v43 = vrot.slane %v6222_v11, 2  ;;  %v1335_v11 = vrot.slane %v6231_v16, 2 }
  0x86   : > { %4779 = vmatmul.mubr.f32.gmra.mrb[4].mxu0 %v6432_v15  ;;  %4405 = vmatprep.mubr.f32.mxu1 %v6435_v9  ;;  %v786_v9 = vrot.slane %v6448_v63, 1  ;;  %v788_v15 = vrot.slane %v6473_v17, 1 }
  0x87   : > { %4781 = vmatprep.mubr.f32.mxu0 %v6442_v5  ;;  %5263 = vmatpush3.bf16.msra.mxu0 %v5260_v50  ;;  %v3861_v50 = vld [vmem:[%s7225_s1 + $0x350] sm:$0xff]  ;;  %v6494_v5 = vsel %vm719_vm0, %v781_v10, %v783_v14  ;;  %v6500_v51 = vsel %vm1299_vm1, %v1326_v33, %v1328_v6  ;;  %v6510_v10 = vsel %vm1299_vm1, %v1330_v1, %v1331_v27  ;;  %v1336_v14 = vrot.slane %v6233_v20, 2  ;;  %v3863_v33 = vld [vmem:[%s7225_s1 + $0x360] sm:$0xff] }
  0x88   : > { %5265 = vmatprep.subr.bf16.mxu0 %v5264_v34  ;;  %7349 = vst [vmem:[#allocation46_spill] sm:$0xff] %v6494_v5  ;;  %7350 = vst [vmem:[#allocation47_spill] sm:$0xff] %v6500_v51  ;;  %v6516_v6 = vld [vmem:[#allocation2 + $0x170] sm:$0xff]  ;;  %v6528_v1 = vsel %vm719_vm0, %v786_v9, %v788_v15  ;;  %v6531_v62 = vsel %vm1299_vm1, %v1331_v27, %v1333_v43  ;;  %v1340_v15 = vrot.slane %v6262_v46, 2  ;;  %v1341_v27 = vrot.slane %v6264_v49, 2 }
  0x89   : > { %4406 = vmatmul.mubr.f32.gmra.mrb[22].mxu1 %v6460_v32  ;;  %v6503_v32 = vsel %vm719_vm0, %v785_v61, %v786_v9  ;;  %v5272_v61 = vpack.c.bf16 %v3862_v37, %v3861_v50  ;;  %7352 = vst [vmem:[#allocation49_spill] sm:$0xff] %v6528_v1  ;;  %7353 = vst [vmem:[#allocation50_spill] sm:$0xff] %v6531_v62  ;;  %v6544_v9 = vsel %vm1299_vm1, %v1335_v11, %v1336_v14 }
  0x8a   : > { %4782 = vmatmul.mubr.f32.gmra.mrb[6].mxu0 %v6463_v29  ;;  %4408 = vmatprep.mubr.f32.mxu1 %v6468_v60  ;;  %7351 = vst [vmem:[#allocation48_spill] sm:$0xff] %v6503_v32  ;;  %v791_v29 = vrot.slane %v6482_v47, 1  ;;  %v6507_v60 = vld [vmem:[#allocation2 + $0x160] sm:$0x3] }
  0x8b   : > { %4784 = vmatprep.mubr.f32.mxu0 %v6476_v2  ;;  %5267 = vmatpush3.bf16.msra.mxu0 %v5264_v34  ;;  %v6514_v2 = vld [vmem:[#allocation2 + $0x168] sm:$0xff]  ;;  %v793_v50 = vrot.slane %v6507_v60, 1 }
  0x8c   : > { %5269 = vmatprep.subr.bf16.mxu0 %v5268_v53  ;;  %v3864_v34 = vld [vmem:[%s7225_s1 + $0x368] sm:$0xff]  ;;  %v6536_v37 = vsel %vm719_vm0, %v790_v26, %v791_v29  ;;  %v795_v31 = vrot.slane %v6514_v2, 1  ;;  %v3866_v26 = vld [vmem:[%s7225_s1 + $0x378] sm:$0xff] }
  0x8d   : > { %4409 = vmatmul.mubr.f32.gmra.mrb[24].mxu1 %v6494_v5  ;;  %7354 = vst [vmem:[#allocation51_spill] sm:$0xff] %v6536_v37  ;;  %v1338_v5 = vrot.slane %v6253_v42, 2  ;;  %v5276_v43 = vpack.c.bf16 %v3864_v34, %v3863_v33  ;;  %v3865_v42 = vld [vmem:[%s7225_s1 + $0x370] sm:$0xff] }
  0x8e   : > { %4785 = vmatmul.mubr.f32.gmra.mrb[8].mxu0 %v6500_v51  ;;  %4411 = vmatprep.mubr.f32.mxu1 %v6503_v32  ;;  %v796_v51 = vrot.slane %v6516_v6, 1  ;;  %v6541_v32 = vld [vmem:[#allocation2 + $0x178] sm:$0x3] }
  0x8f   : > { %4787 = vmatprep.mubr.f32.mxu0 %v6510_v10  ;;  %5271 = vmatpush3.bf16.msra.mxu0 %v5268_v53  ;;  %v6558_v53 = vsel %vm719_vm0, %v791_v29, %v793_v50  ;;  %v798_v11 = vrot.slane %v6541_v32, 1  ;;  %v6563_v33 = vsel %vm1299_vm1, %v1336_v14, %v1338_v5  ;;  %v1346_v29 = vrot.slane %v6313_v48, 2  ;;  %v3867_v5 = vld [vmem:[%s7225_s1 + $0x380] sm:$0xff] }
  0x90   : > { %5273 = vmatprep.subr.bf16.mxu0 %v5272_v61  ;;  %7355 = vst [vmem:[#allocation52_spill] sm:$0xff] %v6558_v53  ;;  %v6566_v34 = vsel %vm719_vm0, %v795_v31, %v796_v51  ;;  %v5280_v50 = vpack.c.bf16 %v3866_v26, %v3865_v42  ;;  %v1350_v42 = vrot.slane %v6344_v0, 2  ;;  %v1351_v26 = vrot.slane %v6346_v7, 2 }
  0x91   : > { %4412 = vmatmul.mubr.f32.gmra.mrb[26].mxu1 %v6528_v1  ;;  %7356 = vst [vmem:[#allocation53_spill] sm:$0xff] %v6566_v34  ;;  %v1343_v1 = vrot.slane %v6284_v12, 2  ;;  %v3868_v12 = vld [vmem:[%s7225_s1 + $0x388] sm:$0xff]  ;;  %v6584_v31 = vsel %vm719_vm0, %v796_v51, %v798_v11  ;;  %v3789_v51 = vld [vmem:[%s7225_s1 + $0x110] sm:$0xff]  ;;  %v1356_v11 = vrot.slane %v6379_v8, 2 }
  0x92   : > { %4788 = vmatmul.mubr.f32.gmra.mrb[10].mxu0 %v6531_v62  ;;  %4414 = vmatprep.mubr.f32.mxu1 %v6536_v37  ;;  %v6570_v62 = vsel %vm1299_vm1, %v1340_v15, %v1341_v27  ;;  %v1345_v37 = vrot.slane %v6311_v54, 2  ;;  %7357 = vst [vmem:[#allocation54_spill] sm:$0xff] %v6584_v31 }
  0x93   : > { %4790 = vmatprep.mubr.f32.mxu0 %v6544_v9  ;;  %5275 = vmatpush3.bf16.msra.mxu0 %v5272_v61  ;;  %v6588_v14 = vsel %vm1299_vm1, %v1341_v27, %v1343_v1  ;;  %v1348_v61 = vrot.slane %v6337_v41, 2  ;;  %v3790_v41 = vld [vmem:[%s7225_s1 + $0x118] sm:$0xff]  ;;  %v6613_v27 = vsel %vm1299_vm1, %v1350_v42, %v1351_v26 }
  0x94   : > { %5277 = vmatprep.subr.bf16.mxu0 %v5276_v43  ;;  %v6592_v15 = vsel %vm1299_vm1, %v1345_v37, %v1346_v29  ;;  %v1353_v37 = vrot.slane %v6370_v28, 2  ;;  %v3792_v28 = vld [vmem:[%s7225_s1 + $0x128] sm:$0xff] }
  0x95   : > { %4415 = vmatmul.mubr.f32.gmra.mrb[28].mxu1 %v6558_v53  ;;  %v6609_v1 = vsel %vm1299_vm1, %v1346_v29, %v1348_v61  ;;  %v1361_v61 = vrot.slane %v6414_v13, 2  ;;  %v6718_v53 = vld [vmem:[#allocation2 + $0x190] sm:$0x3] }
  0x96   : > { %4791 = vmatmul.mubr.f32.gmra.mrb[12].mxu0 %v6563_v33  ;;  %4417 = vmatprep.mubr.f32.mxu1 %v6566_v34  ;;  %v6596_v34 = vpack.c.bf16 %v3868_v12, %v3867_v5  ;;  %v5128_v5 = vpack.c.bf16 %v3790_v41, %v3789_v51  ;;  %v6630_v29 = vsel %vm1299_vm1, %v1351_v26, %v1353_v37  ;;  %v1360_v12 = vrot.slane %v6412_v36, 2 }
  0x97   : > { %4793 = vmatprep.mubr.f32.mxu0 %v6570_v62  ;;  %5279 = vmatpush3.bf16.msra.mxu0 %v5276_v43  ;;  %v1355_v43 = vrot.slane %v6377_v52, 2  ;;  %v1365_v51 = vrot.slane %v6446_v57, 2  ;;  %v1366_v41 = vrot.slane %v6448_v63, 2 }
  0x98   : > { %5281 = vmatprep.subr.bf16.mxu0 %v5280_v50  ;;  %v6653_v26 = vsel %vm1299_vm1, %v1360_v12, %v1361_v61 }
  0x99   : > { %4418 = vmatmul.mubr.f32.gmra.mrb[30].mxu1 %v6584_v31  ;;  %v6698_v31 = vld [vmem:[#allocation2 + $0x188] sm:$0xff] }
  0x9a   : > { %4794 = vmatmul.mubr.f32.gmra.mrb[14].mxu0 %v6588_v14  ;;  %4452 = vmatprep.mubr.f32.mxu1 %v6005_v18  ;;  %v3791_v18 = vld [vmem:[%s7225_s1 + $0x120] sm:$0xff] }
  0x9b   : > { %4796 = vmatprep.mubr.f32.mxu0 %v6592_v15  ;;  %5283 = vmatpush3.bf16.msra.mxu0 %v5280_v50  ;;  %v6634_v50 = vsel %vm1299_vm1, %v1355_v43, %v1356_v11  ;;  %v5132_v42 = vpack.c.bf16 %v3792_v28, %v3791_v18  ;;  %v3795_v43 = vld [vmem:[%s7225_s1 + $0x140] sm:$0xff]  ;;  %v6672_v18 = vsel %vm1299_vm1, %v1365_v51, %v1366_v41  ;;  %v1370_v28 = vrot.slane %v6480_v23, 2 }
  0x9c   : > { %5285 = vmatprep.subr.bf16.mxu0 %v6596_v34  ;;  %v1376_v51 = vrot.slane %v6516_v6, 2 }
  0x9d   : > { %4453 = vmatmul.mubr.f32.vlgmr.msra.gmra.mrb[0].mxu1 %v6007_v19  ;;  %v1358_v19 = vrot.slane %v6405_v30, 2 }
  0x9e   : > { %4797 = vmatmul.mubr.f32.gmra.mrb[16].mxu0 %v6609_v1  ;;  %5127 = vmatpush3.bf16.msra.mxu1 %v6355_v44  ;;  %v3794_v44 = vld [vmem:[%s7225_s1 + $0x138] sm:$0xff] }
  0x9f   : > { %4455 = vmatprep.mubr.f32.mxu1 %v6010_v21  ;;  %4799 = vmatprep.mubr.f32.mxu0 %v6613_v27  ;;  %v3793_v21 = vld [vmem:[%s7225_s1 + $0x130] sm:$0xff]  ;;  %v6649_v30 = vsel %vm1299_vm1, %v1356_v11, %v1358_v19  ;;  %v3796_v11 = vld [vmem:[%s7225_s1 + $0x148] sm:$0xff]  ;;  %v1371_v19 = vrot.slane %v6482_v47, 2 }
  0xa0   : > { %5129 = vmatprep.subr.bf16.mxu1 %v5128_v5  ;;  %v5136_v37 = vpack.c.bf16 %v3794_v44, %v3793_v21  ;;  %v5140_v12 = vpack.c.bf16 %v3796_v11, %v3795_v43  ;;  %v3797_v21 = vld [vmem:[%s7225_s1 + $0x150] sm:$0xff]  ;;  %v6695_v43 = vld [vmem:[#allocation2 + $0x180] sm:$0xff] }
  0xa1   : > { %4456 = vmatmul.mubr.f32.gmra.mrb[2].mxu1 %v6012_v22  ;;  %v1363_v22 = vrot.slane %v6439_v45, 2  ;;  %v6691_v44 = vsel %vm1299_vm1, %v1370_v28, %v1371_v19 }
  0xa2   : > { %4800 = vmatmul.mubr.f32.gmra.mrb[18].mxu0 %v6630_v29  ;;  %4458 = vmatprep.mubr.f32.mxu1 %v6092_v55 }
  0xa3   : > { %4802 = vmatprep.mubr.f32.mxu0 %v6634_v50  ;;  %5131 = vmatpush3.bf16.msra.mxu1 %v5128_v5  ;;  %v6668_v45 = vsel %vm1299_vm1, %v1361_v61, %v1363_v22  ;;  %v1368_v5 = vrot.slane %v6473_v17, 2  ;;  %v3798_v17 = vld [vmem:[%s7225_s1 + $0x158] sm:$0xff]  ;;  %v1375_v22 = vrot.slane %v6514_v2, 2 }
  0xa4   : > { %5133 = vmatprep.subr.bf16.mxu1 %v5132_v42  ;;  %v5144_v11 = vpack.c.bf16 %v3798_v17, %v3797_v21  ;;  %v2244_v21 = vrot.slane %v6695_v43, 2  ;;  %v2245_v17 = vrot.slane %v6698_v31, 2 }
  0xa5   : > { %4459 = vmatmul.mubr.f32.gmra.mrb[4].mxu1 %v6094_v56  ;;  %v6687_v61 = vsel %vm1299_vm1, %v1366_v41, %v1368_v5  ;;  %v3800_v41 = vld [vmem:[%s7225_s1 + $0x168] sm:$0xff]  ;;  %v1378_v5 = vrot.slane %v6541_v32, 2  ;;  %v6714_v28 = vsel %vm1299_vm1, %v1375_v22, %v1376_v51  ;;  %v3802_v32 = vld [vmem:[%s7225_s1 + $0x178] sm:$0xff] }
  0xa6   : > { %4803 = vmatmul.mubr.f32.gmra.mrb[20].mxu0 %v6649_v30  ;;  %4461 = vmatprep.mubr.f32.mxu1 %v6109_v3  ;;  %7358 = vst [vmem:[#allocation55_spill] sm:$0xff] %v6687_v61  ;;  %7359 = vst [vmem:[#allocation56_spill] sm:$0xff] %v6714_v28  ;;  %v6735_v22 = vsel %vm1299_vm1, %v2244_v21, %v2245_v17  ;;  %v3870_v21 = vld [vmem:[%s7225_s1 + $0x398] sm:$0xff] }
  0xa7   : > { %4805 = vmatprep.mubr.f32.mxu0 %v6653_v26  ;;  %5135 = vmatpush3.bf16.msra.mxu1 %v5132_v42  ;;  %v1373_v42 = vrot.slane %v6507_v60, 2  ;;  %v3799_v60 = vld [vmem:[%s7225_s1 + $0x160] sm:$0xff]  ;;  %7361 = vst [vmem:[#allocation58_spill] sm:$0xff] %v6735_v22 }
  0xa8   : > { %5137 = vmatprep.subr.bf16.mxu1 %v5136_v37 }
  0xa9   : > { %4462 = vmatmul.mubr.f32.gmra.mrb[6].mxu1 %v6111_v4 }
  0xaa   : > { %4806 = vmatmul.mubr.f32.gmra.mrb[22].mxu0 %v6668_v45  ;;  %4464 = vmatprep.mubr.f32.mxu1 %v6140_v24 }
  0xab   : > { %4808 = vmatprep.mubr.f32.mxu0 %v6672_v18  ;;  %5139 = vmatpush3.bf16.msra.mxu1 %v5136_v37  ;;  %v6710_v37 = vsel %vm1299_vm1, %v1371_v19, %v1373_v42  ;;  %v3801_v19 = vld [vmem:[%s7225_s1 + $0x170] sm:$0xff]  ;;  %v2247_v42 = vrot.slane %v6718_v53, 2 }
  0xac   : > { %5141 = vmatprep.subr.bf16.mxu1 %v5140_v12 }
  0xad   : > { %4465 = vmatmul.mubr.f32.gmra.mrb[8].mxu1 %v6142_v25 }
  0xae   : > { %4809 = vmatmul.mubr.f32.gmra.mrb[24].mxu0 %v6687_v61  ;;  %4467 = vmatprep.mubr.f32.mxu1 %v6169_v39  ;;  %v5148_v61 = vpack.c.bf16 %v3800_v41, %v3799_v60  ;;  %v5152_v60 = vpack.c.bf16 %v3802_v32, %v3801_v19  ;;  %v3803_v41 = vld [vmem:[%s7225_s1 + $0x180] sm:$0xff]  ;;  %v3873_v19 = vld [vmem:[%s7225_s1 + $0x3b0] sm:$0xff]  ;;  %v3874_v32 = vld [vmem:[%s7225_s1 + $0x3b8] sm:$0xff] }
  0xaf   : > { %4811 = vmatprep.mubr.f32.mxu0 %v6691_v44  ;;  %5143 = vmatpush3.bf16.msra.mxu1 %v5140_v12  ;;  %v6731_v12 = vsel %vm1299_vm1, %v1376_v51, %v1378_v5  ;;  %v6748_v51 = vsel %vm1299_vm1, %v2245_v17, %v2247_v42  ;;  %v3869_v5 = vld [vmem:[%s7225_s1 + $0x390] sm:$0xff]  ;;  %v3872_v17 = vld [vmem:[%s7225_s1 + $0x3a8] sm:$0xff]  ;;  %v3878_v42 = vld [vmem:[%s7225_s1 + $0x3d8] sm:$0xff] }
  0xb0   : > { %5145 = vmatprep.subr.bf16.mxu1 %v5144_v11  ;;  %7360 = vst [vmem:[#allocation57_spill] sm:$0xff] %v6731_v12  ;;  %7362 = vst [vmem:[#allocation59_spill] sm:$0xff] %v6748_v51 }
  0xb1   : > { %4468 = vmatmul.mubr.f32.gmra.mrb[10].mxu1 %v6171_v40 }
  0xb2   : > { %4812 = vmatmul.mubr.f32.gmra.mrb[26].mxu0 %v6710_v37  ;;  %4470 = vmatprep.mubr.f32.mxu1 %v6200_v58 }
  0xb3   : > { %4814 = vmatprep.mubr.f32.mxu0 %v6714_v28  ;;  %5147 = vmatpush3.bf16.msra.mxu1 %v5144_v11  ;;  %v3804_v28 = vld [vmem:[%s7225_s1 + $0x188] sm:$0xff] }
  0xb4   : > { %5149 = vmatprep.subr.bf16.mxu1 %v5148_v61  ;;  %v6750_v11 = vpack.c.bf16 %v3804_v28, %v3803_v41  ;;  %v3871_v28 = vld [vmem:[%s7225_s1 + $0x3a0] sm:$0xff]  ;;  %v3882_v41 = vld [vmem:[%s7225_s1 + $0x3f8] sm:$0xff] }
  0xb5   : > { %4471 = vmatmul.mubr.f32.gmra.mrb[12].mxu1 %v6202_v59 }
  0xb6   : > { %4815 = vmatmul.mubr.f32.gmra.mrb[28].mxu0 %v6731_v12  ;;  %4473 = vmatprep.mubr.f32.mxu1 %v6231_v16 }
  0xb7   : > { %4817 = vmatprep.mubr.f32.mxu0 %v6735_v22  ;;  %5151 = vmatpush3.bf16.msra.mxu1 %v5148_v61  ;;  %v5288_v61 = vpack.c.bf16 %v3870_v21, %v3869_v5  ;;  %v5678_v5 = vld [vmem:[#allocation2 + $0x8] sm:$0xff] }
  0xb8   : > { %5153 = vmatprep.subr.bf16.mxu1 %v5152_v60  ;;  %v1301_v21 = vrot.slane %v5678_v5, 2  ;;  %v3817_v5 = vld [vmem:[%s7225_s1 + $0x1f0] sm:$0xff]  ;;  %v5692_v22 = vld [vmem:[#allocation2 + $0xa8] sm:$0xff] }
  0xb9   : > { %4474 = vmatmul.mubr.f32.gmra.mrb[14].mxu1 %v6233_v20 }
  0xba   : > { %4818 = vmatmul.mubr.f32.gmra.mrb[30].mxu0 %v6748_v51  ;;  %4476 = vmatprep.mubr.f32.mxu1 %v6262_v46  ;;  %v5691_v51 = vld [vmem:[#allocation2 + $0x98] sm:$0xff] }
  0xbb   : > { %4852 = vmatprep.mubr.f32.mxu0 %v6092_v55  ;;  %5155 = vmatpush3.bf16.msra.mxu1 %v5152_v60  ;;  %v5292_v55 = vpack.c.bf16 %v3872_v17, %v3871_v28  ;;  %v3880_v60 = vld [vmem:[%s7225_s1 + $0x3e8] sm:$0xff]  ;;  %v3883_v28 = vld [vmem:[%s7225_s1 + $0x400] sm:$0xff]  ;;  %v5679_v17 = vld [vmem:[#allocation2 + $0x10] sm:$0x3] }
  0xbc   : > { %5157 = vmatprep.subr.bf16.mxu1 %v6750_v11 }
  0xbd   : > { %4477 = vmatmul.mubr.f32.gmra.mrb[16].mxu1 %v6264_v49 }
  0xbe   : > { %4853 = vmatmul.mubr.f32.vlgmr.msra.gmra.mrb[0].mxu0 %v6094_v56  ;;  %4479 = vmatprep.mubr.f32.mxu1 %v6311_v54  ;;  %v5296_v56 = vpack.c.bf16 %v3874_v32, %v3873_v19  ;;  %v3805_v32 = vld [vmem:[%s7225_s1 + $0x190] sm:$0xff] }
  0xbf   : > { %5287 = vmatpush3.bf16.msra.mxu0 %v6596_v34  ;;  %4855 = vmatprep.mubr.f32.mxu0 %v6109_v3  ;;  %v3875_v3 = vld [vmem:[%s7225_s1 + $0x3c0] sm:$0xff]  ;;  %v3876_v34 = vld [vmem:[%s7225_s1 + $0x3c8] sm:$0xff] }
  0xc0   : > { %5289 = vmatprep.subr.bf16.mxu0 %v5288_v61 }
  0xc1   : > { %4480 = vmatmul.mubr.f32.gmra.mrb[18].mxu1 %v6313_v48 }
  0xc2   : > { %4856 = vmatmul.mubr.f32.gmra.mrb[2].mxu0 %v6111_v4  ;;  %4482 = vmatprep.mubr.f32.mxu1 %v6344_v0  ;;  %v5300_v4 = vpack.c.bf16 %v3876_v34, %v3875_v3  ;;  %v3807_v3 = vld [vmem:[%s7225_s1 + $0x1a0] sm:$0xff]  ;;  %v3808_v34 = vld [vmem:[%s7225_s1 + $0x1a8] sm:$0xff] }
  0xc3   : > { %4858 = vmatprep.mubr.f32.mxu0 %v6140_v24  ;;  %5291 = vmatpush3.bf16.msra.mxu0 %v5288_v61  ;;  %v3877_v24 = vld [vmem:[%s7225_s1 + $0x3d0] sm:$0xff] }
  0xc4   : > { %5293 = vmatprep.subr.bf16.mxu0 %v5292_v55 }
  0xc5   : > { %4483 = vmatmul.mubr.f32.gmra.mrb[20].mxu1 %v6346_v7 }
  0xc6   : > { %4859 = vmatmul.mubr.f32.gmra.mrb[4].mxu0 %v6142_v25  ;;  %4485 = vmatprep.mubr.f32.mxu1 %v6377_v52  ;;  %v5304_v25 = vpack.c.bf16 %v3878_v42, %v3877_v24  ;;  %v7366_v24 = vld [vmem:[#allocation39_spill] sm:$0xff]  ;;  %v3813_v42 = vld [vmem:[%s7225_s1 + $0x1d0] sm:$0xff] }
  0xc7   : > { %4861 = vmatprep.mubr.f32.mxu0 %v6169_v39  ;;  %5295 = vmatpush3.bf16.msra.mxu0 %v5292_v55  ;;  %v3879_v39 = vld [vmem:[%s7225_s1 + $0x3e0] sm:$0xff]  ;;  %v1303_v55 = vrot.slane %v5679_v17, 2 }
  0xc8   : > { %5297 = vmatprep.subr.bf16.mxu0 %v5296_v56  ;;  %v6914_v17 = vld [vmem:[#allocation2 + $0x1a0] sm:$0xff] }
  0xc9   : > { %4486 = vmatmul.mubr.f32.gmra.mrb[22].mxu1 %v6379_v8 }
  0xca   : > { %4862 = vmatmul.mubr.f32.gmra.mrb[6].mxu0 %v6171_v40  ;;  %4488 = vmatprep.mubr.f32.mxu1 %v6412_v36  ;;  %v5308_v40 = vpack.c.bf16 %v3880_v60, %v3879_v39  ;;  %v7368_v60 = vld [vmem:[#allocation43_spill] sm:$0xff] }
  0xcb   : > { %4864 = vmatprep.mubr.f32.mxu0 %v6200_v58  ;;  %5299 = vmatpush3.bf16.msra.mxu0 %v5296_v56  ;;  %v3881_v58 = vld [vmem:[%s7225_s1 + $0x3f0] sm:$0xff] }
  0xcc   : > { %5301 = vmatprep.subr.bf16.mxu0 %v5300_v4  ;;  %v5312_v61 = vpack.c.bf16 %v3882_v41, %v3881_v58  ;;  %v3816_v58 = vld [vmem:[%s7225_s1 + $0x1e8] sm:$0xff]  ;;  %v7369_v41 = vld [vmem:[#allocation45_spill] sm:$0xff] }
  0xcd   : > { %4489 = vmatmul.mubr.f32.gmra.mrb[24].mxu1 %v6414_v13 }
  0xce   : > { %4865 = vmatmul.mubr.f32.gmra.mrb[8].mxu0 %v6202_v59  ;;  %4491 = vmatprep.mubr.f32.mxu1 %v6446_v57  ;;  %v5677_v59 = vld [vmem:[#allocation2] sm:$0xff] }
  0xcf   : > { %4867 = vmatprep.mubr.f32.mxu0 %v6231_v16  ;;  %5303 = vmatpush3.bf16.msra.mxu0 %v5300_v4  ;;  %v1300_v16 = vrot.slane %v5677_v59, 2  ;;  %v3810_v4 = vld [vmem:[%s7225_s1 + $0x1b8] sm:$0xff] }
  0xd0   : > { %5305 = vmatprep.subr.bf16.mxu0 %v5304_v25 }
  0xd1   : > { %4492 = vmatmul.mubr.f32.gmra.mrb[26].mxu1 %v6448_v63 }
  0xd2   : > { %4868 = vmatmul.mubr.f32.gmra.mrb[10].mxu0 %v6233_v20  ;;  %4494 = vmatprep.mubr.f32.mxu1 %v6480_v23  ;;  %v3884_v20 = vld [vmem:[%s7225_s1 + $0x408] sm:$0xff] }
  0xd3   : > { %4870 = vmatprep.mubr.f32.mxu0 %v6262_v46  ;;  %5307 = vmatpush3.bf16.msra.mxu0 %v5304_v25  ;;  %v1302_v46 = vsel %vm1299_vm1, %v1300_v16, %v1301_v21  ;;  %v6835_v19 = vpack.c.bf16 %v3884_v20, %v3883_v28  ;;  %v3814_v25 = vld [vmem:[%s7225_s1 + $0x1d8] sm:$0xff]  ;;  %v7370_v16 = vld [vmem:[#allocation47_spill] sm:$0xff]  ;;  %v7371_v20 = vld [vmem:[#allocation50_spill] sm:$0xff] }
  0xd4   : > { %5309 = vmatprep.subr.bf16.mxu0 %v5308_v40  ;;  %v5176_v39 = vpack.c.bf16 %v3814_v25, %v3813_v42  ;;  %v3892_v42 = vld [vmem:[%s7225_s1 + $0x448] sm:$0xff] }
  0xd5   : > { %4495 = vmatmul.mubr.f32.gmra.mrb[28].mxu1 %v6482_v47  ;;  %v7378_v25 = vld [vmem:[#allocation23_spill] sm:$0xff] }
  0xd6   : > { %4871 = vmatmul.mubr.f32.gmra.mrb[12].mxu0 %v6264_v49  ;;  %4497 = vmatprep.mubr.f32.mxu1 %v6514_v2  ;;  %v3806_v49 = vld [vmem:[%s7225_s1 + $0x198] sm:$0xff] }
  0xd7   : > { %4873 = vmatprep.mubr.f32.mxu0 %v6311_v54  ;;  %5311 = vmatpush3.bf16.msra.mxu0 %v5308_v40  ;;  %v1304_v54 = vsel %vm1299_vm1, %v1301_v21, %v1303_v55  ;;  %v5160_v56 = vpack.c.bf16 %v3806_v49, %v3805_v32  ;;  %v3815_v40 = vld [vmem:[%s7225_s1 + $0x1e0] sm:$0xff]  ;;  %v3818_v21 = vld [vmem:[%s7225_s1 + $0x1f8] sm:$0xff]  ;;  %v3885_v55 = vld [vmem:[%s7225_s1 + $0x410] sm:$0xff] }
  0xd8   : > { %5313 = vmatprep.subr.bf16.mxu0 %v5312_v61  ;;  %v5180_v59 = vpack.c.bf16 %v3816_v58, %v3815_v40  ;;  %v5184_v28 = vpack.c.bf16 %v3818_v21, %v3817_v5  ;;  %v7372_v32 = vld [vmem:[#allocation18_spill] sm:$0xff]  ;;  %v3893_v58 = vld [vmem:[%s7225_s1 + $0x450] sm:$0xff]  ;;  %v7380_v5 = vld [vmem:[#allocation25_spill] sm:$0xff] }
  0xd9   : > { %4498 = vmatmul.mubr.f32.gmra.mrb[30].mxu1 %v6516_v6  ;;  %v7381_v21 = vld [vmem:[#allocation26_spill] sm:$0xff] }
  0xda   : > { %4874 = vmatmul.mubr.f32.gmra.mrb[14].mxu0 %v6313_v48  ;;  %4532 = vmatprep.mubr.f32.mxu1 %v1302_v46  ;;  %v5164_v48 = vpack.c.bf16 %v3808_v34, %v3807_v3  ;;  %v3886_v46 = vld [vmem:[%s7225_s1 + $0x418] sm:$0xff]  ;;  %v3888_v3 = vld [vmem:[%s7225_s1 + $0x428] sm:$0xff] }
  0xdb   : > { %4876 = vmatprep.mubr.f32.mxu0 %v6344_v0  ;;  %5315 = vmatpush3.bf16.msra.mxu0 %v5312_v61  ;;  %v3809_v0 = vld [vmem:[%s7225_s1 + $0x1b0] sm:$0xff]  ;;  %v6908_v61 = vld [vmem:[#allocation2 + $0x198] sm:$0xff]  ;;  %v5320_v49 = vpack.c.bf16 %v3886_v46, %v3885_v55  ;;  %v7374_v34 = vld [vmem:[#allocation19_spill] sm:$0xff] }
  0xdc   : > { %5317 = vmatprep.subr.bf16.mxu0 %v6835_v19  ;;  %v3895_v55 = vld [vmem:[%s7225_s1 + $0x460] sm:$0xff]  ;;  %v3896_v46 = vld [vmem:[%s7225_s1 + $0x468] sm:$0xff] }
  0xdd   : > { %4533 = vmatmul.mubr.f32.vlgmr.msra.gmra.mrb[0].mxu1 %v1304_v54  ;;  %v7373_v54 = vld [vmem:[#allocation10_spill] sm:$0xff] }
  0xde   : > { %4877 = vmatmul.mubr.f32.gmra.mrb[16].mxu0 %v6346_v7  ;;  %5159 = vmatpush3.bf16.msra.mxu1 %v6750_v11  ;;  %v7363_v7 = vld [vmem:[#allocation33_spill] sm:$0xff]  ;;  %v3812_v11 = vld [vmem:[%s7225_s1 + $0x1c8] sm:$0xff] }
  0xdf   : > { %4535 = vmatprep.mubr.f32.mxu1 %v6340_v35  ;;  %4879 = vmatprep.mubr.f32.mxu0 %v6377_v52  ;;  %v5168_v35 = vpack.c.bf16 %v3810_v4, %v3809_v0  ;;  %v7364_v52 = vld [vmem:[#allocation35_spill] sm:$0xff]  ;;  %v3889_v4 = vld [vmem:[%s7225_s1 + $0x430] sm:$0xff] }
  0xe0   : > { %5161 = vmatprep.subr.bf16.mxu1 %v5160_v56 }
  0xe1   : > { %4536 = vmatmul.mubr.f32.gmra.mrb[2].mxu1 %v6363_v38  ;;  %v3811_v38 = vld [vmem:[%s7225_s1 + $0x1c0] sm:$0xff] }
  0xe2   : > { %4880 = vmatmul.mubr.f32.gmra.mrb[18].mxu0 %v6379_v8  ;;  %4538 = vmatprep.mubr.f32.mxu1 %v7363_v7  ;;  %v7365_v8 = vld [vmem:[#allocation37_spill] sm:$0xff] }
  0xe3   : > { %4882 = vmatprep.mubr.f32.mxu0 %v6412_v36  ;;  %5163 = vmatpush3.bf16.msra.mxu1 %v5160_v56  ;;  %v5172_v36 = vpack.c.bf16 %v3812_v11, %v3811_v38  ;;  %v3887_v56 = vld [vmem:[%s7225_s1 + $0x420] sm:$0xff]  ;;  %v7376_v38 = vld [vmem:[#allocation21_spill] sm:$0xff] }
  0xe4   : > { %5165 = vmatprep.subr.bf16.mxu1 %v5164_v48  ;;  %v5324_v0 = vpack.c.bf16 %v3888_v3, %v3887_v56  ;;  %v7377_v11 = vld [vmem:[#allocation22_spill] sm:$0xff]  ;;  %v5340_v56 = vpack.c.bf16 %v3896_v46, %v3895_v55  ;;  %v7384_v3 = vld [vmem:[#allocation55_spill] sm:$0xff]  ;;  %v7396_v46 = vld [vmem:[#allocation44_spill] sm:$0xff] }
  0xe5   : > { %4539 = vmatmul.mubr.f32.gmra.mrb[4].mxu1 %v7364_v52  ;;  %v5684_v55 = vld [vmem:[#allocation2 + $0x48] sm:$0xff] }
  0xe6   : > { %4883 = vmatmul.mubr.f32.gmra.mrb[20].mxu0 %v6414_v13  ;;  %4541 = vmatprep.mubr.f32.mxu1 %v7365_v8  ;;  %v7367_v13 = vld [vmem:[#allocation41_spill] sm:$0xff] }
  0xe7   : > { %4885 = vmatprep.mubr.f32.mxu0 %v6446_v57  ;;  %5167 = vmatpush3.bf16.msra.mxu1 %v5164_v48  ;;  %v7375_v48 = vld [vmem:[#allocation20_spill] sm:$0xff] }
  0xe8   : > { %5169 = vmatprep.subr.bf16.mxu1 %v5168_v35 }
  0xe9   : > { %4542 = vmatmul.mubr.f32.gmra.mrb[6].mxu1 %v7366_v24 }
  0xea   : > { %4886 = vmatmul.mubr.f32.gmra.mrb[22].mxu0 %v6448_v63  ;;  %4544 = vmatprep.mubr.f32.mxu1 %v7367_v13 }
  0xeb   : > { %4888 = vmatprep.mubr.f32.mxu0 %v6480_v23  ;;  %5171 = vmatpush3.bf16.msra.mxu1 %v5168_v35  ;;  %v3890_v35 = vld [vmem:[%s7225_s1 + $0x438] sm:$0xff] }
  0xec   : > { %5173 = vmatprep.subr.bf16.mxu1 %v5172_v36 }
  0xed   : > { %4545 = vmatmul.mubr.f32.gmra.mrb[8].mxu1 %v7368_v60 }
  0xee   : > { %4889 = vmatmul.mubr.f32.gmra.mrb[24].mxu0 %v6482_v47  ;;  %4547 = vmatprep.mubr.f32.mxu1 %v7369_v41 }
  0xef   : > { %4891 = vmatprep.mubr.f32.mxu0 %v6514_v2  ;;  %5175 = vmatpush3.bf16.msra.mxu1 %v5172_v36  ;;  %v3891_v36 = vld [vmem:[%s7225_s1 + $0x440] sm:$0xff] }
  0xf0   : > { %5177 = vmatprep.subr.bf16.mxu1 %v5176_v39  ;;  %v5332_v40 = vpack.c.bf16 %v3892_v42, %v3891_v36  ;;  %v7390_v36 = vld [vmem:[#allocation34_spill] sm:$0xff]  ;;  %v5680_v42 = vld [vmem:[#allocation2 + $0x18] sm:$0xff] }
  0xf1   : > { %4548 = vmatmul.mubr.f32.gmra.mrb[10].mxu1 %v7370_v16 }
  0xf2   : > { %4892 = vmatmul.mubr.f32.gmra.mrb[26].mxu0 %v6516_v6  ;;  %4550 = vmatprep.mubr.f32.mxu1 %v6510_v10 }
  0xf3   : > { %4894 = vmatprep.mubr.f32.mxu0 %v6695_v43  ;;  %5179 = vmatpush3.bf16.msra.mxu1 %v5176_v39  ;;  %v7379_v39 = vld [vmem:[#allocation24_spill] sm:$0xff] }
  0xf4   : > { %5181 = vmatprep.subr.bf16.mxu1 %v5180_v59 }
  0xf5   : > { %4551 = vmatmul.mubr.f32.gmra.mrb[12].mxu1 %v7371_v20 }
  0xf6   : > { %4895 = vmatmul.mubr.f32.gmra.mrb[28].mxu0 %v6698_v31  ;;  %4553 = vmatprep.mubr.f32.mxu1 %v6544_v9 }
  0xf7   : > { %4897 = vmatprep.mubr.f32.mxu0 %v6908_v61  ;;  %5183 = vmatpush3.bf16.msra.mxu1 %v5180_v59  ;;  %v3894_v59 = vld [vmem:[%s7225_s1 + $0x458] sm:$0xff] }
  0xf8   : > { %5185 = vmatprep.subr.bf16.mxu1 %v5184_v28 }
  0xf9   : > { %4554 = vmatmul.mubr.f32.gmra.mrb[14].mxu1 %v6563_v33 }
  0xfa   : > { %4898 = vmatmul.mubr.f32.gmra.mrb[30].mxu0 %v6914_v17  ;;  %4556 = vmatprep.mubr.f32.mxu1 %v6570_v62 }
  0xfb   : > { %4932 = vmatprep.mubr.f32.mxu0 %v7372_v32  ;;  %5187 = vmatpush3.bf16.msra.mxu1 %v5184_v28  ;;  %v5336_v28 = vpack.c.bf16 %v3894_v59, %v3893_v58  ;;  %v7382_v32 = vld [vmem:[#allocation27_spill] sm:$0xff]  ;;  %v5682_v58 = vld [vmem:[#allocation2 + $0x30] sm:$0xff] }
  0xfc   : > { %5348 = vmatprep.subr.bf16.mxu1 %v7373_v54  ;;  %v7393_v59 = vld [vmem:[#allocation40_spill] sm:$0xff] }
  0xfd   : > { %4557 = vmatmul.mubr.f32.gmra.mrb[16].mxu1 %v6588_v14 }
  0xfe   : > { %4933 = vmatmul.mubr.f32.vlgmr.msra.gmra.mrb[0].mxu0 %v7374_v34  ;;  %4559 = vmatprep.mubr.f32.mxu1 %v6592_v15  ;;  %v3897_v34 = vld [vmem:[%s7225_s1 + $0x470] sm:$0xff] }
  0xff   : > { %5319 = vmatpush3.bf16.msra.mxu0 %v6835_v19  ;;  %4935 = vmatprep.mubr.f32.mxu0 %v7375_v48  ;;  %v5328_v19 = vpack.c.bf16 %v3890_v35, %v3889_v4  ;;  %v3898_v48 = vld [vmem:[%s7225_s1 + $0x478] sm:$0xff]  ;;  %v7386_v4 = vld [vmem:[#allocation30_spill] sm:$0xff] }
 0x100   : > { %5321 = vmatprep.subr.bf16.mxu0 %v5320_v49  ;;  %v5344_v35 = vpack.c.bf16 %v3898_v48, %v3897_v34  ;;  %v7399_v34 = vld [vmem:[#allocation48_spill] sm:$0xff]  ;;  %v7400_v48 = vld [vmem:[#allocation13_spill] sm:$0xff] }
 0x101   : > { %4560 = vmatmul.mubr.f32.gmra.mrb[18].mxu1 %v6609_v1 }
 0x102   : > { %4936 = vmatmul.mubr.f32.gmra.mrb[2].mxu0 %v7376_v38  ;;  %4562 = vmatprep.mubr.f32.mxu1 %v6613_v27  ;;  %v7387_v38 = vld [vmem:[#allocation31_spill] sm:$0xff] }
 0x103   : > { %4938 = vmatprep.mubr.f32.mxu0 %v7377_v11  ;;  %5323 = vmatpush3.bf16.msra.mxu0 %v5320_v49  ;;  %v7383_v49 = vld [vmem:[#allocation28_spill] sm:$0xff] }
 0x104   : > { %5325 = vmatprep.subr.bf16.mxu0 %v5324_v0  ;;  %v7388_v11 = vld [vmem:[#allocation56_spill] sm:$0xff] }
 0x105   : > { %4563 = vmatmul.mubr.f32.gmra.mrb[20].mxu1 %v6630_v29 }
 0x106   : > { %4939 = vmatmul.mubr.f32.gmra.mrb[4].mxu0 %v7378_v25  ;;  %4565 = vmatprep.mubr.f32.mxu1 %v6634_v50  ;;  %v7391_v25 = vld [vmem:[#allocation36_spill] sm:$0xff] }
 0x107   : > { %4941 = vmatprep.mubr.f32.mxu0 %v7379_v39  ;;  %5327 = vmatpush3.bf16.msra.mxu0 %v5324_v0  ;;  %v7385_v0 = vld [vmem:[#allocation29_spill] sm:$0xff]  ;;  %v5681_v39 = vld [vmem:[#allocation2 + $0x20] sm:$0xff] }
 0x108   : > { %5329 = vmatprep.subr.bf16.mxu0 %v5328_v19 }
 0x109   : > { %4566 = vmatmul.mubr.f32.gmra.mrb[22].mxu1 %v6649_v30 }
 0x10a   : > { %4942 = vmatmul.mubr.f32.gmra.mrb[6].mxu0 %v7380_v5  ;;  %4568 = vmatprep.mubr.f32.mxu1 %v6653_v26  ;;  %v7394_v5 = vld [vmem:[#allocation11_spill] sm:$0xff] }
 0x10b   : > { %4944 = vmatprep.mubr.f32.mxu0 %v7381_v21  ;;  %5331 = vmatpush3.bf16.msra.mxu0 %v5328_v19  ;;  %v7389_v19 = vld [vmem:[#allocation32_spill] sm:$0xff]  ;;  %v5683_v21 = vld [vmem:[#allocation2 + $0x38] sm:$0xff] }
 0x10c   : > { %5333 = vmatprep.subr.bf16.mxu0 %v5332_v40 }
 0x10d   : > { %4569 = vmatmul.mubr.f32.gmra.mrb[24].mxu1 %v6668_v45 }
 0x10e   : > { %4945 = vmatmul.mubr.f32.gmra.mrb[8].mxu0 %v7382_v32  ;;  %4571 = vmatprep.mubr.f32.mxu1 %v6672_v18  ;;  %v7397_v32 = vld [vmem:[#allocation12_spill] sm:$0xff] }
 0x10f   : > { %4947 = vmatprep.mubr.f32.mxu0 %v7383_v49  ;;  %5335 = vmatpush3.bf16.msra.mxu0 %v5332_v40  ;;  %v7392_v40 = vld [vmem:[#allocation38_spill] sm:$0xff]  ;;  %v5685_v49 = vld [vmem:[#allocation2 + $0x50] sm:$0xff] }
 0x110   : > { %5337 = vmatprep.subr.bf16.mxu0 %v5336_v28 }
 0x111   : > { %4572 = vmatmul.mubr.f32.gmra.mrb[26].mxu1 %v7384_v3 }
 0x112   : > { %4948 = vmatmul.mubr.f32.gmra.mrb[10].mxu0 %v7385_v0  ;;  %4574 = vmatprep.mubr.f32.mxu1 %v6691_v44  ;;  %v5687_v0 = vld [vmem:[#allocation2 + $0x68] sm:$0xff] }
 0x113   : > { %4950 = vmatprep.mubr.f32.mxu0 %v7386_v4  ;;  %5339 = vmatpush3.bf16.msra.mxu0 %v5336_v28  ;;  %v7395_v28 = vld [vmem:[#allocation42_spill] sm:$0xff]  ;;  %v7401_v4 = vld [vmem:[#allocation49_spill] sm:$0xff] }
 0x114   : > { %5341 = vmatprep.subr.bf16.mxu0 %v5340_v56 }
 0x115   : > { %4575 = vmatmul.mubr.f32.gmra.mrb[28].mxu1 %v6710_v37 }
 0x116   : > { %4951 = vmatmul.mubr.f32.gmra.mrb[12].mxu0 %v7387_v38  ;;  %4577 = vmatprep.mubr.f32.mxu1 %v7388_v11  ;;  %v7402_v38 = vld [vmem:[#allocation51_spill] sm:$0xff] }
 0x117   : > { %4953 = vmatprep.mubr.f32.mxu0 %v7389_v19  ;;  %5343 = vmatpush3.bf16.msra.mxu0 %v5340_v56  ;;  %v5686_v56 = vld [vmem:[#allocation2 + $0x60] sm:$0xff] }
 0x118   : > { %5345 = vmatprep.subr.bf16.mxu0 %v5344_v35 }
 0x119   : > { %4578 = vmatmul.mubr.f32.gmra.mrb[30].mxu1 %v6731_v12  ;;  %v5693_v12 = vld [vmem:[#allocation2 + $0xb0] sm:$0xff] }
 0x11a   : > { %4954 = vmatmul.mubr.f32.gmra.mrb[14].mxu0 %v7390_v36  ;;  %4612 = vmatprep.mubr.f32.mxu1 %v5680_v42  ;;  %v1963_v42 = vrot.slane %v6695_v43, 1 }
 0x11b   : > { %4956 = vmatprep.mubr.f32.mxu0 %v7391_v25  ;;  %5347 = vmatpush3.bf16.msra.mxu0 %v5344_v35  ;;  %v5688_v35 = vld [vmem:[#allocation2 + $0x78] sm:$0xff] }
 0x11d   : > { %4613 = vmatmul.mubr.f32.vlgmr.msra.gmra.mrb[0].mxu1 %v5681_v39  ;;  %v1964_v39 = vrot.slane %v6698_v31, 1 }
 0x11e   : > { %4957 = vmatmul.mubr.f32.gmra.mrb[16].mxu0 %v7392_v40  ;;  %5356 = vmatpush3.bf16.msra.mxu1 %v7373_v54  ;;  %v7398_v54 = vld [vmem:[#allocation46_spill] sm:$0xff] }
 0x11f   : > { %4615 = vmatprep.mubr.f32.mxu1 %v5682_v58  ;;  %4959 = vmatprep.mubr.f32.mxu0 %v7393_v59  ;;  %v7403_v58 = vld [vmem:[#allocation14_spill] sm:$0xff] }
 0x120   : > { %5349 = vmatprep.subr.bf16.mxu1 %v7394_v5 }
 0x121   : > { %4616 = vmatmul.mubr.f32.gmra.mrb[2].mxu1 %v5683_v21  ;;  %v7404_v21 = vld [vmem:[#allocation52_spill] sm:$0xff] }
 0x122   : > { %4960 = vmatmul.mubr.f32.gmra.mrb[18].mxu0 %v7395_v28  ;;  %4618 = vmatprep.mubr.f32.mxu1 %v5684_v55  ;;  %v5690_v55 = vld [vmem:[#allocation2 + $0x90] sm:$0xff] }
 0x123   : > { %4962 = vmatprep.mubr.f32.mxu0 %v7396_v46  ;;  %5357 = vmatpush3.bf16.msra.mxu1 %v7394_v5  ;;  %v5689_v5 = vld [vmem:[#allocation2 + $0x80] sm:$0xff] }
 0x124   : > { %5350 = vmatprep.subr.bf16.mxu1 %v7397_v32 }
 0x125   : > { %4619 = vmatmul.mubr.f32.gmra.mrb[4].mxu1 %v5685_v49  ;;  %v1966_v49 = vrot.slane %v6718_v53, 1 }
 0x126   : > { %4963 = vmatmul.mubr.f32.gmra.mrb[20].mxu0 %v7398_v54  ;;  %4621 = vmatprep.mubr.f32.mxu1 %v5686_v56  ;;  %v2802_v56 = vrot.slane %v6908_v61, 1 }
 0x127   : > { %4965 = vmatprep.mubr.f32.mxu0 %v7399_v34  ;;  %5358 = vmatpush3.bf16.msra.mxu1 %v7397_v32  ;;  %v7405_v32 = vld [vmem:[#allocation53_spill] sm:$0xff]  ;;  %v7028_v53 = vsel %vm719_vm0, %v1964_v39, %v1966_v49  ;;  %v5695_v49 = vld [vmem:[#allocation2 + $0xc8] sm:$0xff] }
 0x128   : > { %5351 = vmatprep.subr.bf16.mxu1 %v7400_v48 }
 0x129   : > { %4622 = vmatmul.mubr.f32.gmra.mrb[6].mxu1 %v5687_v0  ;;  %v7020_v0 = vsel %vm719_vm0, %v1963_v42, %v1964_v39  ;;  %v7409_v39 = vld [vmem:[#allocation17_spill] sm:$0xff] }
 0x12a   : > { %4966 = vmatmul.mubr.f32.gmra.mrb[22].mxu0 %v7401_v4  ;;  %4624 = vmatprep.mubr.f32.mxu1 %v5688_v35  ;;  %v7022_v35 = vld [vmem:[#allocation2 + $0x1a8] sm:$0x3] }
 0x12b   : > { %4968 = vmatprep.mubr.f32.mxu0 %v7402_v38  ;;  %5359 = vmatpush3.bf16.msra.mxu1 %v7400_v48  ;;  %v2803_v48 = vrot.slane %v6914_v17, 1 }
 0x12c   : > { %5352 = vmatprep.subr.bf16.mxu1 %v7403_v58 }
 0x12d   : > { %4625 = vmatmul.mubr.f32.gmra.mrb[8].mxu1 %v5689_v5  ;;  %v7406_v5 = vld [vmem:[#allocation15_spill] sm:$0xff]  ;;  %v2804_v42 = vsel %vm719_vm0, %v2802_v56, %v2803_v48  ;;  %v5698_v56 = vld [vmem:[#allocation2 + $0xf0] sm:$0xff] }
 0x12e   : > { %4969 = vmatmul.mubr.f32.gmra.mrb[24].mxu0 %v7404_v21  ;;  %4627 = vmatprep.mubr.f32.mxu1 %v5690_v55  ;;  %v7407_v55 = vld [vmem:[#allocation54_spill] sm:$0xff] }
 0x12f   : > { %4971 = vmatprep.mubr.f32.mxu0 %v7405_v32  ;;  %5360 = vmatpush3.bf16.msra.mxu1 %v7403_v58  ;;  %v2805_v58 = vrot.slane %v7022_v35, 1  ;;  %v7408_v32 = vld [vmem:[#allocation16_spill] sm:$0xff] }
 0x130   : > { %5353 = vmatprep.subr.bf16.mxu1 %v7406_v5 }
 0x131   : > { %4628 = vmatmul.mubr.f32.gmra.mrb[10].mxu1 %v5691_v51  ;;  %v5694_v51 = vld [vmem:[#allocation2 + $0xc0] sm:$0xff] }
 0x132   : > { %4972 = vmatmul.mubr.f32.gmra.mrb[26].mxu0 %v7407_v55  ;;  %4630 = vmatprep.mubr.f32.mxu1 %v5692_v22  ;;  %v2806_v22 = vsel %vm719_vm0, %v2803_v48, %v2805_v58  ;;  %v5700_v48 = vld [vmem:[#allocation2 + $0x108] sm:$0xff]  ;;  %v5701_v58 = vld [vmem:[#allocation2 + $0x110] sm:$0xff] }
 0x133   : > { %4974 = vmatprep.mubr.f32.mxu0 %v7020_v0  ;;  %5361 = vmatpush3.bf16.msra.mxu1 %v7406_v5  ;;  %v5696_v5 = vld [vmem:[#allocation2 + $0xd8] sm:$0xff] }
 0x134   : > { %5354 = vmatprep.subr.bf16.mxu1 %v7408_v32 }
 0x135   : > { %4631 = vmatmul.mubr.f32.gmra.mrb[12].mxu1 %v5693_v12  ;;  %v5697_v12 = vld [vmem:[#allocation2 + $0xe0] sm:$0xff] }
 0x136   : > { %4975 = vmatmul.mubr.f32.gmra.mrb[28].mxu0 %v7028_v53  ;;  %4633 = vmatprep.mubr.f32.mxu1 %v5694_v51 }
 0x137   : > { %4977 = vmatprep.mubr.f32.mxu0 %v2804_v42  ;;  %5362 = vmatpush3.bf16.msra.mxu1 %v7408_v32  ;;  %v5699_v32 = vld [vmem:[#allocation2 + $0xf8] sm:$0xff] }
 0x138   : > { %5355 = vmatprep.subr.bf16.mxu1 %v7409_v39 }
 0x139   : > { %4634 = vmatmul.mubr.f32.gmra.mrb[14].mxu1 %v5695_v49 }
 0x13a   : > { %4978 = vmatmul.mubr.f32.gmra.mrb[30].mxu0 %v2806_v22  ;;  %4636 = vmatprep.mubr.f32.mxu1 %v5696_v5 }
 0x13b   : > { %5012 = vmatprep.mubr.f32.mxu0 %v7363_v7  ;;  %5363 = vmatpush3.bf16.msra.mxu1 %v7409_v39  ;;  %v5702_v7 = vld [vmem:[#allocation2 + $0x120] sm:$0xff] }
 0x13d   : > { %4637 = vmatmul.mubr.f32.gmra.mrb[16].mxu1 %v5697_v12 }
 0x13e   : > { %5013 = vmatmul.mubr.f32.vlgmr.msra.gmra.mrb[0].mxu0 %v7364_v52  ;;  %4639 = vmatprep.mubr.f32.mxu1 %v5698_v56  ;;  %v5703_v52 = vld [vmem:[#allocation2 + $0x128] sm:$0xff] }
 0x13f   : > { %5015 = vmatprep.mubr.f32.mxu0 %v7365_v8 }
 0x141   : > { %4640 = vmatmul.mubr.f32.gmra.mrb[18].mxu1 %v5699_v32 }
 0x142   : > { %5016 = vmatmul.mubr.f32.gmra.mrb[2].mxu0 %v7366_v24  ;;  %4642 = vmatprep.mubr.f32.mxu1 %v5700_v48 }
 0x143   : > { %5018 = vmatprep.mubr.f32.mxu0 %v7367_v13  ;;  %v7101_v13 = vld [vmem:[%s7226_s2] ss:$0 sm:$0xff] }
 0x145   : > { %4643 = vmatmul.mubr.f32.gmra.mrb[20].mxu1 %v5701_v58 }
 0x146   : > { %5019 = vmatmul.mubr.f32.gmra.mrb[4].mxu0 %v7368_v60  ;;  %4645 = vmatprep.mubr.f32.mxu1 %v5702_v7 }
 0x147   : > { %5021 = vmatprep.mubr.f32.mxu0 %v7369_v41 }
 0x149   : > { %4646 = vmatmul.mubr.f32.gmra.mrb[22].mxu1 %v5703_v52 }
 0x14a   : > { %5022 = vmatmul.mubr.f32.gmra.mrb[6].mxu0 %v7370_v16  ;;  %4648 = vmatprep.mubr.f32.mxu1 %v6446_v57  ;;  %v3084_v57 = vrot.slane %v6914_v17, 2 }
 0x14b   : > { %5024 = vmatprep.mubr.f32.mxu0 %v6510_v10 }
 0x14d   : > { %4649 = vmatmul.mubr.f32.gmra.mrb[24].mxu1 %v6448_v63  ;;  %v7410_v63 = vld [vmem:[#allocation57_spill] sm:$0xff] }
 0x14e   : > { %5025 = vmatmul.mubr.f32.gmra.mrb[8].mxu0 %v7371_v20  ;;  %4651 = vmatprep.mubr.f32.mxu1 %v6480_v23  ;;  %v7412_v23 = vld [vmem:[#allocation58_spill] sm:$0xff] }
 0x14f   : > { %5027 = vmatprep.mubr.f32.mxu0 %v6544_v9 }
 0x151   : > { %4652 = vmatmul.mubr.f32.gmra.mrb[26].mxu1 %v6482_v47  ;;  %v3086_v47 = vrot.slane %v7022_v35, 2 }
 0x152   : > { %5028 = vmatmul.mubr.f32.gmra.mrb[10].mxu0 %v6563_v33  ;;  %4654 = vmatprep.mubr.f32.mxu1 %v6514_v2  ;;  %v7411_v2 = vld [vmem:[#allocation53_spill] sm:$0xff] }
 0x153   : > { %5030 = vmatprep.mubr.f32.mxu0 %v6570_v62  ;;  %v3083_v62 = vrot.slane %v6908_v61, 2  ;;  %v3087_v9 = vsel %vm1299_vm1, %v3084_v57, %v3086_v47 }
 0x155   : > { %4655 = vmatmul.mubr.f32.gmra.mrb[28].mxu1 %v6516_v6  ;;  %v3085_v10 = vsel %vm1299_vm1, %v3083_v62, %v3084_v57  ;;  %v7413_v6 = vld [vmem:[#allocation59_spill] sm:$0xff] }
 0x156   : > { %5031 = vmatmul.mubr.f32.gmra.mrb[12].mxu0 %v6588_v14  ;;  %4657 = vmatprep.mubr.f32.mxu1 %v6695_v43 }
 0x157   : > { %5033 = vmatprep.mubr.f32.mxu0 %v6592_v15 }
 0x159   : > { %4658 = vmatmul.mubr.f32.gmra.mrb[30].mxu1 %v6698_v31 }
 0x15a   : > { %5034 = vmatmul.mubr.f32.gmra.mrb[14].mxu0 %v6609_v1  ;;  %4716 = vmatprep.mubr.f32.mxu1 %v7389_v19 }
 0x15b   : > { %5036 = vmatprep.mubr.f32.mxu0 %v6613_v27 }
 0x15d   : > { %4717 = vmatmul.mubr.f32.vlgmr.msra.gmra.mrb[16].mxu1 %v7390_v36 }
 0x15e   : > { %5037 = vmatmul.mubr.f32.gmra.mrb[16].mxu0 %v6630_v29  ;;  %4719 = vmatprep.mubr.f32.mxu1 %v7391_v25 }
 0x15f   : > { %5039 = vmatprep.mubr.f32.mxu0 %v6634_v50 }
 0x161   : > { %4720 = vmatmul.mubr.f32.gmra.mrb[18].mxu1 %v7392_v40 }
 0x162   : > { %5040 = vmatmul.mubr.f32.gmra.mrb[18].mxu0 %v6649_v30  ;;  %4722 = vmatprep.mubr.f32.mxu1 %v7393_v59 }
 0x163   : > { %5042 = vmatprep.mubr.f32.mxu0 %v6653_v26 }
 0x165   : > { %4723 = vmatmul.mubr.f32.gmra.mrb[20].mxu1 %v7395_v28 }
 0x166   : > { %5043 = vmatmul.mubr.f32.gmra.mrb[20].mxu0 %v6668_v45  ;;  %4725 = vmatprep.mubr.f32.mxu1 %v7396_v46 }
 0x167   : > { %5045 = vmatprep.mubr.f32.mxu0 %v6672_v18 }
 0x169   : > { %4726 = vmatmul.mubr.f32.gmra.mrb[22].mxu1 %v7398_v54 }
 0x16a   : > { %5046 = vmatmul.mubr.f32.gmra.mrb[22].mxu0 %v7384_v3  ;;  %4728 = vmatprep.mubr.f32.mxu1 %v7399_v34 }
 0x16b   : > { %5048 = vmatprep.mubr.f32.mxu0 %v6691_v44 }
 0x16d   : > { %4729 = vmatmul.mubr.f32.gmra.mrb[24].mxu1 %v7401_v4 }
 0x16e   : > { %5049 = vmatmul.mubr.f32.gmra.mrb[24].mxu0 %v6710_v37  ;;  %4731 = vmatprep.mubr.f32.mxu1 %v7402_v38 }
 0x16f   : > { %5051 = vmatprep.mubr.f32.mxu0 %v7388_v11 }
 0x171   : > { %4732 = vmatmul.mubr.f32.gmra.mrb[26].mxu1 %v7404_v21 }
 0x172   : > { %5052 = vmatmul.mubr.f32.gmra.mrb[26].mxu0 %v7410_v63  ;;  %4734 = vmatprep.mubr.f32.mxu1 %v7411_v2 }
 0x173   : > { %5054 = vmatprep.mubr.f32.mxu0 %v7412_v23 }
 0x175   : > { %4735 = vmatmul.mubr.f32.gmra.mrb[28].mxu1 %v7407_v55 }
 0x176   : > { %5055 = vmatmul.mubr.f32.gmra.mrb[28].mxu0 %v7413_v6  ;;  %4737 = vmatprep.mubr.f32.mxu1 %v7020_v0 }
 0x177   : > { %5057 = vmatprep.mubr.f32.mxu0 %v3085_v10 }
 0x179   : > { %4738 = vmatmul.mubr.f32.gmra.mrb[30].mxu1 %v7028_v53 }
 0x17a   : > { %5058 = vmatmul.mubr.f32.gmra.mrb[30].mxu0 %v3087_v9 }
 0x1f0   : > { %v4614_v33 = vpop.f32.mrb[0].mxu1 }
 0x1f1   : > { %v1769_v31 = vpop.f32.mrb[1].mxu1 }
 0x1f4   : > { %v4617_v14 = vpop.f32.mrb[2].mxu1 }
 0x1f5   : > { %v1779_v15 = vpop.f32.mrb[3].mxu1 }
 0x1f8   : > { %v4620_v1 = vpop.f32.mrb[4].mxu1 }
 0x1f9   : > { %v1789_v27 = vpop.f32.mrb[5].mxu1 }
 0x1fc   : > { %v4623_v29 = vpop.f32.mrb[6].mxu1 }
 0x1fd   : > { %v1799_v50 = vpop.f32.mrb[7].mxu1 }
 0x200   : > { %v4626_v30 = vpop.f32.mrb[8].mxu1 }
 0x201   : > { %v1809_v26 = vpop.f32.mrb[9].mxu1 }
 0x204   : > { %v4629_v45 = vpop.f32.mrb[10].mxu1 }
 0x205   : > { %v1819_v18 = vpop.f32.mrb[11].mxu1 }
 0x208   : > { %v4632_v44 = vpop.f32.mrb[12].mxu1 }
 0x209   : > { %v1829_v43 = vpop.f32.mrb[13].mxu1 }
 0x20c   : > { %v4635_v37 = vpop.f32.mrb[14].mxu1 }
 0x20d   : > { %v1839_v8 = vpop.f32.mrb[15].mxu1 }
 0x211   : > { %v5014_v24 = vpop.f32.mrb[0].mxu0 }
 0x212   : > { %v5364_v60 = vadd.f32 %v5014_v24, %v4614_v33  ;;  %v3173_v41 = vpop.f32.mrb[1].mxu0 }
 0x213   : > { %v5365_v16 = vadd.f32 %v3173_v41, %v1769_v31 }
 0x214   : > { %v3372_v61 = vadd.f32 %v5364_v60, %v7101_v13 }
 0x215   : > { %v3371_v20 = vadd.f32 %v5365_v16, %v7101_v13  ;;  %v5017_v17 = vpop.f32.mrb[2].mxu0 }
 0x216   : > { %3404 = vst [vmem:[%s5930_s5 + $0x8] sm:$0xff] %v3372_v61  ;;  %v5366_v3 = vadd.f32 %v5017_v17, %v4617_v14  ;;  %v3183_v11 = vpop.f32.mrb[3].mxu0 }
 0x217   : > { %3403 = vst [vmem:[%s5930_s5] sm:$0xff] %v3371_v20  ;;  %v5367_v19 = vadd.f32 %v3183_v11, %v1779_v15 }
 0x218   : > { %v3374_v36 = vadd.f32 %v5366_v3, %v7101_v13 }
 0x219   : > { %v3373_v25 = vadd.f32 %v5367_v19, %v7101_v13  ;;  %v5020_v40 = vpop.f32.mrb[4].mxu0 }
 0x21a   : > { %3406 = vst [vmem:[%s5930_s5 + $0x18] sm:$0xff] %v3374_v36  ;;  %v5368_v59 = vadd.f32 %v5020_v40, %v4620_v1  ;;  %v3193_v28 = vpop.f32.mrb[5].mxu0 }
 0x21b   : > { %3405 = vst [vmem:[%s5930_s5 + $0x10] sm:$0xff] %v3373_v25  ;;  %v5369_v46 = vadd.f32 %v3193_v28, %v1789_v27 }
 0x21c   : > { %v3376_v54 = vadd.f32 %v5368_v59, %v7101_v13 }
 0x21d   : > { %v3375_v34 = vadd.f32 %v5369_v46, %v7101_v13  ;;  %v5023_v4 = vpop.f32.mrb[6].mxu0 }
 0x21e   : > { %3408 = vst [vmem:[%s5930_s5 + $0x28] sm:$0xff] %v3376_v54  ;;  %v5370_v38 = vadd.f32 %v5023_v4, %v4623_v29  ;;  %v3203_v21 = vpop.f32.mrb[7].mxu0 }
 0x21f   : > { %3407 = vst [vmem:[%s5930_s5 + $0x20] sm:$0xff] %v3375_v34  ;;  %v5371_v0 = vadd.f32 %v3203_v21, %v1799_v50 }
 0x220   : > { %v3378_v35 = vadd.f32 %v5370_v38, %v7101_v13 }
 0x221   : > { %v3377_v55 = vadd.f32 %v5371_v0, %v7101_v13  ;;  %v5026_v53 = vpop.f32.mrb[8].mxu0 }
 0x222   : > { %3410 = vst [vmem:[%s5930_s5 + $0x38] sm:$0xff] %v3378_v35  ;;  %v5372_v42 = vadd.f32 %v5026_v53, %v4626_v30  ;;  %v3213_v51 = vpop.f32.mrb[9].mxu0 }
 0x223   : > { %3409 = vst [vmem:[%s5930_s5 + $0x30] sm:$0xff] %v3377_v55  ;;  %v5373_v22 = vadd.f32 %v3213_v51, %v1809_v26 }
 0x224   : > { %v3380_v39 = vadd.f32 %v5372_v42, %v7101_v13 }
 0x225   : > { %v3379_v49 = vadd.f32 %v5373_v22, %v7101_v13  ;;  %v5029_v5 = vpop.f32.mrb[10].mxu0 }
 0x226   : > { %3412 = vst [vmem:[%s5930_s5 + $0x48] sm:$0xff] %v3380_v39  ;;  %v5374_v12 = vadd.f32 %v5029_v5, %v4629_v45  ;;  %v3223_v56 = vpop.f32.mrb[11].mxu0 }
 0x227   : > { %3411 = vst [vmem:[%s5930_s5 + $0x40] sm:$0xff] %v3379_v49  ;;  %v5375_v32 = vadd.f32 %v3223_v56, %v1819_v18 }
 0x228   : > { %v3382_v48 = vadd.f32 %v5374_v12, %v7101_v13 }
 0x229   : > { %v3381_v58 = vadd.f32 %v5375_v32, %v7101_v13  ;;  %v5032_v7 = vpop.f32.mrb[12].mxu0 }
 0x22a   : > { %3414 = vst [vmem:[%s5930_s5 + $0x58] sm:$0xff] %v3382_v48  ;;  %v5376_v52 = vadd.f32 %v5032_v7, %v4632_v44  ;;  %v3233_v62 = vpop.f32.mrb[13].mxu0 }
 0x22b   : > { %3413 = vst [vmem:[%s5930_s5 + $0x50] sm:$0xff] %v3381_v58  ;;  %v5377_v57 = vadd.f32 %v3233_v62, %v1829_v43 }
 0x22c   : > { %v3384_v63 = vadd.f32 %v5376_v52, %v7101_v13 }
 0x22d   : > { %v3383_v2 = vadd.f32 %v5377_v57, %v7101_v13  ;;  %v5035_v23 = vpop.f32.mrb[14].mxu0 }
 0x22e   : > { %3416 = vst [vmem:[%s5930_s5 + $0x68] sm:$0xff] %v3384_v63  ;;  %v5378_v47 = vadd.f32 %v5035_v23, %v4635_v37  ;;  %v3243_v10 = vpop.f32.mrb[15].mxu0 }
 0x22f   : > { %3415 = vst [vmem:[%s5930_s5 + $0x60] sm:$0xff] %v3383_v2  ;;  %v5379_v6 = vadd.f32 %v3243_v10, %v1839_v8 }
 0x230   : > { %v3386_v9 = vadd.f32 %v5378_v47, %v7101_v13  ;;  %v4718_v33 = vpop.f32.mrb[16].mxu1 }
 0x231   : > { %v3385_v31 = vadd.f32 %v5379_v6, %v7101_v13  ;;  %v5038_v14 = vpop.f32.mrb[16].mxu0  ;;  %v2133_v15 = vpop.f32.mrb[17].mxu1 }
 0x232   : > { %3418 = vst [vmem:[%s5930_s5 + $0x78] sm:$0xff] %v3386_v9  ;;  %v5380_v1 = vadd.f32 %v5038_v14, %v4718_v33  ;;  %v3253_v27 = vpop.f32.mrb[17].mxu0 }
 0x233   : > { %3417 = vst [vmem:[%s5930_s5 + $0x70] sm:$0xff] %v3385_v31  ;;  %v5381_v29 = vadd.f32 %v3253_v27, %v2133_v15 }
 0x234   : > { %v3388_v50 = vadd.f32 %v5380_v1, %v7101_v13  ;;  %v4721_v30 = vpop.f32.mrb[18].mxu1 }
 0x235   : > { %v3387_v26 = vadd.f32 %v5381_v29, %v7101_v13  ;;  %v5041_v45 = vpop.f32.mrb[18].mxu0  ;;  %v2143_v18 = vpop.f32.mrb[19].mxu1 }
 0x236   : > { %3420 = vst [vmem:[%s5930_s5 + $0x88] sm:$0xff] %v3388_v50  ;;  %v5382_v44 = vadd.f32 %v5041_v45, %v4721_v30  ;;  %v3263_v43 = vpop.f32.mrb[19].mxu0 }
 0x237   : > { %3419 = vst [vmem:[%s5930_s5 + $0x80] sm:$0xff] %v3387_v26  ;;  %v5383_v37 = vadd.f32 %v3263_v43, %v2143_v18 }
 0x238   : > { %v3390_v8 = vadd.f32 %v5382_v44, %v7101_v13  ;;  %v4724_v24 = vpop.f32.mrb[20].mxu1 }
 0x239   : > { %v3389_v60 = vadd.f32 %v5383_v37, %v7101_v13  ;;  %v5044_v41 = vpop.f32.mrb[20].mxu0  ;;  %v2153_v16 = vpop.f32.mrb[21].mxu1 }
 0x23a   : > { %3422 = vst [vmem:[%s5930_s5 + $0x98] sm:$0xff] %v3390_v8  ;;  %v5384_v61 = vadd.f32 %v5044_v41, %v4724_v24  ;;  %v3273_v20 = vpop.f32.mrb[21].mxu0 }
 0x23b   : > { %3421 = vst [vmem:[%s5930_s5 + $0x90] sm:$0xff] %v3389_v60  ;;  %v5385_v17 = vadd.f32 %v3273_v20, %v2153_v16 }
 0x23c   : > { %v3392_v3 = vadd.f32 %v5384_v61, %v7101_v13  ;;  %v4727_v11 = vpop.f32.mrb[22].mxu1 }
 0x23d   : > { %v3391_v19 = vadd.f32 %v5385_v17, %v7101_v13  ;;  %v5047_v36 = vpop.f32.mrb[22].mxu0  ;;  %v2163_v25 = vpop.f32.mrb[23].mxu1 }
 0x23e   : > { %3424 = vst [vmem:[%s5930_s5 + $0xa8] sm:$0xff] %v3392_v3  ;;  %v5386_v40 = vadd.f32 %v5047_v36, %v4727_v11  ;;  %v3283_v59 = vpop.f32.mrb[23].mxu0 }
 0x23f   : > { %3423 = vst [vmem:[%s5930_s5 + $0xa0] sm:$0xff] %v3391_v19  ;;  %v5387_v28 = vadd.f32 %v3283_v59, %v2163_v25 }
 0x240   : > { %v3394_v46 = vadd.f32 %v5386_v40, %v7101_v13  ;;  %v4730_v54 = vpop.f32.mrb[24].mxu1 }
 0x241   : > { %v3393_v34 = vadd.f32 %v5387_v28, %v7101_v13  ;;  %v5050_v4 = vpop.f32.mrb[24].mxu0  ;;  %v2173_v38 = vpop.f32.mrb[25].mxu1 }
 0x242   : > { %3426 = vst [vmem:[%s5930_s5 + $0xb8] sm:$0xff] %v3394_v46  ;;  %v5388_v21 = vadd.f32 %v5050_v4, %v4730_v54  ;;  %v3293_v0 = vpop.f32.mrb[25].mxu0 }
 0x243   : > { %3425 = vst [vmem:[%s5930_s5 + $0xb0] sm:$0xff] %v3393_v34  ;;  %v5389_v35 = vadd.f32 %v3293_v0, %v2173_v38 }
 0x244   : > { %v3396_v55 = vadd.f32 %v5388_v21, %v7101_v13  ;;  %v4733_v53 = vpop.f32.mrb[26].mxu1 }
 0x245   : > { %v3395_v42 = vadd.f32 %v5389_v35, %v7101_v13  ;;  %v5053_v51 = vpop.f32.mrb[26].mxu0  ;;  %v2183_v22 = vpop.f32.mrb[27].mxu1 }
 0x246   : > { %3428 = vst [vmem:[%s5930_s5 + $0xc8] sm:$0xff] %v3396_v55  ;;  %v5390_v39 = vadd.f32 %v5053_v51, %v4733_v53  ;;  %v3303_v49 = vpop.f32.mrb[27].mxu0 }
 0x247   : > { %3427 = vst [vmem:[%s5930_s5 + $0xc0] sm:$0xff] %v3395_v42  ;;  %v5391_v5 = vadd.f32 %v3303_v49, %v2183_v22 }
 0x248   : > { %v3398_v12 = vadd.f32 %v5390_v39, %v7101_v13  ;;  %v4736_v56 = vpop.f32.mrb[28].mxu1 }
 0x249   : > { %v3397_v32 = vadd.f32 %v5391_v5, %v7101_v13  ;;  %v5056_v48 = vpop.f32.mrb[28].mxu0  ;;  %v2193_v58 = vpop.f32.mrb[29].mxu1 }
 0x24a   : > { %3430 = vst [vmem:[%s5930_s5 + $0xd8] sm:$0xff] %v3398_v12  ;;  %v5392_v7 = vadd.f32 %v5056_v48, %v4736_v56  ;;  %v3313_v52 = vpop.f32.mrb[29].mxu0 }
 0x24b   : > { %3429 = vst [vmem:[%s5930_s5 + $0xd0] sm:$0xff] %v3397_v32  ;;  %v5393_v62 = vadd.f32 %v3313_v52, %v2193_v58 }
 0x24c   : > { %v3400_v57 = vadd.f32 %v5392_v7, %v7101_v13  ;;  %v4739_v63 = vpop.f32.mrb[30].mxu1 }
 0x24d   : > { %v3399_v2 = vadd.f32 %v5393_v62, %v7101_v13  ;;  %v5059_v23 = vpop.f32.mrb[30].mxu0  ;;  %v2203_v47 = vpop.f32.mrb[31].mxu1 }
 0x24e   : > { %3432 = vst [vmem:[%s5930_s5 + $0xe8] sm:$0xff] %v3400_v57  ;;  %v5394_v10 = vadd.f32 %v5059_v23, %v4739_v63  ;;  %v3323_v6 = vpop.f32.mrb[31].mxu0 }
 0x24f   : > { %3431 = vst [vmem:[%s5930_s5 + $0xe0] sm:$0xff] %v3399_v2  ;;  %v5395_v9 = vadd.f32 %v3323_v6, %v2203_v47 }
 0x250   : > { %v3402_v33 = vadd.f32 %v5394_v10, %v7101_v13 }
 0x251   : > { %v3401_v31 = vadd.f32 %v5395_v9, %v7101_v13 }
 0x252   : > { %3434 = vst [vmem:[%s5930_s5 + $0xf8] sm:$0xff] %v3402_v33 }
 0x253   : > { %3433 = vst [vmem:[%s5930_s5 + $0xf0] sm:$0xff] %v3401_v31 }
 0x254   : > { %5717 = shalt.err (!%p5714_p3)
}
 0x255   : > { %s5718_s26 = scalar_lea.hbm %s7169_s23, 4096  ;;  %s5722_s6 = scalar_lea.hbm %s7227_s3, 8192 }
 0x256   : > { %p5719_p5 = scmp.ne.s32.totalorder %s7169_s23, %s5718_s26  ;;  %p5723_p9 = scmp.lt.u32.totalorder %s7169_s23, %s7227_s3 }
 0x257   : > { %p5724_p10 = scmp.lt.u32.totalorder %s5722_s6, %s5718_s26  ;;  %p5726_p12 = scmp.lt.u32.totalorder %s5718_s26, %s7169_s23 }
 0x258   : > { %p5720_p6 = pnand %p5719_p5, %p5849_p4 }
 0x259   : > { %p5725_p11 = por %p5724_p10, %p5723_p9 }
 0x25a   : > { %p5721_p7 = pneg %p5720_p6 }
 0x25b   : > { %p5727_p13 = por %p5726_p12, %p5725_p11 }
 0x25d   : > { %p5728_p0 = pnand %p5727_p13, %p5721_p7 }
 0x25f   : > { %5731 = shalt.err (!%p5728_p0)
}
 0x260   : > { %s5787_s9 = smov 128   ;;  %s5788_s10 = smov 8  }
 0x261   : > { %5620 = dma.vmem_to_hbm [thread:$0]  (%p5849_p4), %s7171_s18, 4096, %s7169_s23, %s7178_s15, %s5787_s9, %s5787_s9, %s5788_s10  }
 0x262 PF: > { %p5626_p1 = scmp.ge.s32.totalorder %s5784_s17, 2  ;;  %s3468_s11 = sand.u32 1, %s5764_s12  }
 0x263   : > { %s3469_s19 = scalar_lea.sflag [#allocation5], %s3468_s11 }
 0x264   : > { %p5623_p2 = pnand %p5626_p1, %p5856_p8 }
 0x266   : > { %5759 = dma.done.wait (!%p5623_p2), %s3469_s19, 4096  }
 0x267   : > { %5761 = vsyncadd (!%p5623_p2), %s3469_s19, 4294963200  ;;  %s16_s17 = sadd.s32 1, %s5784_s17   ;;  %s7414_s12 = smov %s5768_s13 }
 0x268   : > { %p13_p3 = scmp.ge.s32.totalorder %s16_s17, 4   ;;  %s7415_s13 = smov %s5772_s14 }
 0x269   : > { %s7416_s14 = smov %s5862_s25  ;;  %s7417_s15 = smov %s5780_s16 }
 0x26a   : > { %s7418_s16 = smov %s7420_s20  ;;  %15 = sbr.rel (!%p13_p3) target bundleno = 4 (0x4), region = 191 }
 0x271   :  { %3474 = vsyncpa [#allocation5], 1 }
 0x272   :  { %3476 = vsyncpa [#allocation5 + $0x1], 1 }
 0x273   :  { %3477 = vsyncmov [#allocation3] }
 0x276   :  { %s3478_s22 = vpop.sfrf %3477 }
 0x277   :  { %p3905_p4 = scmp.ne.s32.totalorder %s3478_s22, 0 }
 0x279   :  { %3482 = shalt.err (%p3905_p4)  }
 0x27a   :  { %3484 = vsyncmov [#allocation3 + $0x1] }
 0x27d   :  { %s3485_s24 = vpop.sfrf %3484 }
 0x27e   :  { %p3906_p8 = scmp.ne.s32.totalorder %s3485_s24, 0 }
 0x280   :  { %3489 = shalt.err (%p3906_p8)  }

</bundles_post_ra>
